<compile_context>
chip_gen: v7x
topology: tpu7x:2x2x1
jax: 0.10.0
libtpu: 0.0.40
codegen_flags: <defaults>
</compile_context>

<pallas_src>
import functools

import jax
import jax.numpy as jnp
import numpy as np
from jax.experimental import pallas as pl
from jax.experimental.pallas import tpu as pltpu

LEAKY_SLOPE = 0.2
BN_EPS = 1e-5
_VMEM_LIMIT = 48 * 1024 * 1024   # explicit scoped-VMEM budget (safe on v5e/v6e/v7x)


def _deconv_stats_kernel(xc_ref, w_ref, y_ref, stats_ref):
    """Pass 1: transposed conv (4 phases, one fused K=4*Cin matmul each) + BN partials.

    xc_ref:    (H+1, W+1, 4*Cin) bf16  tap-stacked zero-padded input, whole image
               resident in VMEM across the row-tile grid axis.
    w_ref:     (2, 2, 4*Cin, Cout) bf16 per-phase weight slabs.
    y_ref:     (TM, 2, W, 2*Cout) f32  pre-activation tile; phase (a, b) lives at
               y_ref[:, a, :, b*Cout:(b+1)*Cout]  (wrapper interleave is reshape-only).
    stats_ref: (2, Cout) f32  per-tile [sum; sum-of-squares] partial BN statistics.
    """
    r = pl.program_id(1)
    TM = y_ref.shape[0]
    W = y_ref.shape[2]
    Cout = stats_ref.shape[1]
    K = xc_ref.shape[2]

    row0 = pl.multiple_of(r * TM, TM)
    ssum = jnp.zeros((1, Cout), jnp.float32)
    ssq = jnp.zeros((1, Cout), jnp.float32)

    for a in range(2):            # output-row phase: output row = 2*m + a
        for b in range(2):        # output-col phase: output col = 2*k + b
            # One MXU matmul per phase: all 4 kernel taps fused into K = 4*Cin.
            patch = xc_ref[pl.ds(row0 + a, TM), b:b + W, :]        # (TM, W, 4*Cin) bf16
            patch = patch.reshape(TM * W, K)
            acc = jax.lax.dot_general(                             # (TM*W, Cout) f32
                patch, w_ref[a, b], (((1,), (0,)), ((), ())),
                preferred_element_type=jnp.float32)
            ssum = ssum + jnp.sum(acc, axis=0, keepdims=True)
            ssq = ssq + jnp.sum(acc * acc, axis=0, keepdims=True)
            # Raw pre-activation straight to the output tile: no phase accumulators
            # are kept live; normalization happens in pass 2.
            y_ref[:, a, :, b * Cout:(b + 1) * Cout] = acc.reshape(TM, W, Cout)

    stats_ref[0:1, :] = ssum
    stats_ref[1:2, :] = ssq


def _bn_lrelu_kernel(y_ref, scale_ref, shift_ref, o_ref):
    """Pass 2: y * scale + shift followed by LeakyReLU(0.2), written in place."""
    t = y_ref[...] * scale_ref[...] + shift_ref[...]
    o_ref[...] = jnp.where(t >= 0, t, LEAKY_SLOPE * t)


def _pick_row_tile(H, W, Cout, budget_bytes=2 * 1024 * 1024):
    """Largest divisor of H whose f32 output tile (all 4 phases) fits the budget."""
    per_row = 4 * W * Cout * 4
    best = 1
    for d in range(1, H + 1):
        if H % d == 0 and d * per_row <= budget_bytes:
            best = d
    return best


@functools.partial(jax.jit, static_argnames=("row_tile",))
def block_forward(x_nchw, weight, gamma, beta, *, row_tile=None):
    """x_nchw: [N, Cin, H, W]; weight: [Cin, Cout, 4, 4] (PyTorch ConvTranspose2d);
    gamma/beta: [Cout].  Returns [N, Cout, 2H, 2W] float32 (training-mode BatchNorm)."""
    N, Cin, H, W = x_nchw.shape
    Cout = weight.shape[1]
    K = 4 * Cin

    if row_tile is None:
        row_tile = _pick_row_tile(H, W, Cout)
    TM = int(row_tile)
    assert H % TM == 0, (H, TM)
    RT = H // TM

    # ---- input-side prep (small tensors; fused by XLA) ------------------------------
    # NHWC, zero-pad by 1, then stack the four 2x2 taps (dy, dx) along channels so the
    # kernel runs ONE K=4*Cin matmul per output phase with no in-kernel concatenation.
    x = jnp.transpose(x_nchw, (0, 2, 3, 1)).astype(jnp.float32)            # NHWC
    xp = jnp.pad(x, ((0, 0), (1, 1), (1, 1), (0, 0)))                      # (N,H+2,W+2,Cin)
    taps = [xp[:, dy:dy + H + 1, dx:dx + W + 1, :] for dy in (0, 1) for dx in (0, 1)]
    xcat = jnp.concatenate(taps, axis=-1).astype(jnp.bfloat16)             # (N,H+1,W+1,4Cin)

    # Per-phase weight slabs: output pixel (2m+a, 2k+b) uses kernel taps
    # (ky, kx) = (3-a-2*dy, 3-b-2*dx), stacked in the same (dy, dx) order as xcat.
    w = jnp.transpose(weight, (2, 3, 0, 1)).astype(jnp.bfloat16)           # (ky,kx,Cin,Cout)
    slabs = []
    for a in range(2):
        row = []
        for b in range(2):
            tap_ws = [w[3 - a - 2 * dy, 3 - b - 2 * dx] for dy in (0, 1) for dx in (0, 1)]
            row.append(jnp.concatenate(tap_ws, axis=0))                    # (4*Cin, Cout)
        slabs.append(jnp.stack(row, axis=0))
    w_slab = jnp.stack(slabs, axis=0)                                      # (2,2,4*Cin,Cout)

    # ---- pass 1: transposed conv + partial BN statistics, grid = (N, H/TM) ----------
    y5, stats = pl.pallas_call(
        _deconv_stats_kernel,
        grid=(N, RT),
        in_specs=[
            # whole tap-stacked image stays resident across its row tiles
            pl.BlockSpec((None, H + 1, W + 1, K), lambda n, r: (n, 0, 0, 0)),
            pl.BlockSpec((2, 2, K, Cout), lambda n, r: (0, 0, 0, 0)),
        ],
        out_specs=(
            pl.BlockSpec((None, TM, 2, W, 2 * Cout), lambda n, r: (n, r, 0, 0, 0)),
            pl.BlockSpec((None, None, 2, Cout), lambda n, r: (n, r, 0, 0)),
        ),
        out_shape=(
            jax.ShapeDtypeStruct((N, H, 2, W, 2 * Cout), jnp.float32),
            jax.ShapeDtypeStruct((N, RT, 2, Cout), jnp.float32),
        ),
        compiler_params=pltpu.CompilerParams(
            dimension_semantics=("parallel", "parallel"),
            vmem_limit_bytes=_VMEM_LIMIT),
    )(xcat, w_slab)

    # ---- BatchNorm2d training-mode statistics (tiny per-channel math) ---------------
    sums = jnp.sum(stats, axis=(0, 1))                                     # (2, Cout)
    count = jnp.float32(N * 4 * H * W)
    mean = sums[0] / count
    # NOTE: E[x^2] - mean^2 in f32; fine for near-zero-mean conv outputs — use a
    # shifted / two-pass variance if |mean| >> std in production.
    var = sums[1] / count - mean * mean
    inv = jax.lax.rsqrt(var + BN_EPS)
    g = gamma.astype(jnp.float32)
    scale = (g * inv).reshape(1, Cout)
    shift = (beta.astype(jnp.float32) - mean * g * inv).reshape(1, Cout)

    # (N, H, 2, W, 2*Cout) -> (N, 2H, 2W, Cout): pure reshape, no data movement.
    y4 = y5.reshape(N, 2 * H, 2 * W, Cout)

    # ---- pass 2: normalize + LeakyReLU, in place (aliased buffer) --------------------
    TR = 2 * TM
    y4 = pl.pallas_call(
        _bn_lrelu_kernel,
        grid=(N, RT),
        in_specs=[
            pl.BlockSpec((None, TR, 2 * W, Cout), lambda n, r: (n, r, 0, 0)),
            pl.BlockSpec((1, Cout), lambda n, r: (0, 0)),
            pl.BlockSpec((1, Cout), lambda n, r: (0, 0)),
        ],
        out_specs=pl.BlockSpec((None, TR, 2 * W, Cout), lambda n, r: (n, r, 0, 0)),
        out_shape=jax.ShapeDtypeStruct((N, 2 * H, 2 * W, Cout), jnp.float32),
        input_output_aliases={0: 0},
        compiler_params=pltpu.CompilerParams(
            dimension_semantics=("parallel", "parallel"),
            vmem_limit_bytes=_VMEM_LIMIT),
    )(y4, scale, shift)

    return jnp.transpose(y4, (0, 3, 1, 2))                                 # back to NCHW


def reference_block(x, w, gamma, beta):
    """Pure-numpy (f64-accumulation) reference: scatter-form ConvTranspose2d +
    BatchNorm(training, biased var) + LeakyReLU.  x/w are quantized to bf16 first to
    match the kernel's MXU operand precision."""
    x = np.asarray(jnp.asarray(x, jnp.float32).astype(jnp.bfloat16).astype(jnp.float32),
                   dtype=np.float64)
    w = np.asarray(jnp.asarray(w, jnp.float32).astype(jnp.bfloat16).astype(jnp.float32),
                   dtype=np.float64)
    N, Cin, H, W = x.shape
    Cout = w.shape[1]
    Ho, Wo = 2 * H, 2 * W
    y = np.zeros((N, Cout, Ho + 2, Wo + 2), np.float64)   # extra border for the scatter
    for iy in range(H):
        for ix in range(W):
            contrib = np.einsum('ni,iokl->nokl', x[:, :, iy, ix], w)   # [N, Cout, 4, 4]
            oy = 2 * iy - 1 + 1        # +1 offset for the border
            ox = 2 * ix - 1 + 1
            y[:, :, oy:oy + 4, ox:ox + 4] += contrib
    y = y[:, :, 1:1 + Ho, 1:1 + Wo]
    mean = y.mean(axis=(0, 2, 3), keepdims=True)
    var = y.var(axis=(0, 2, 3), keepdims=True)            # biased, like BN in training
    yn = (y - mean) / np.sqrt(var + BN_EPS)
    yn = yn * np.asarray(gamma, np.float64).reshape(1, -1, 1, 1) \
         + np.asarray(beta, np.float64).reshape(1, -1, 1, 1)
    return np.where(yn >= 0, yn, LEAKY_SLOPE * yn)


if __name__ == "__main__":
    key = jax.random.PRNGKey(0)
    kx, kw, kg, kb = jax.random.split(key, 4)

    N, Cin, Cout, H, W = 2, 4, 8, 16, 16
    x = jax.random.normal(kx, (N, Cin, H, W), jnp.float32)
    weight = 0.1 * jax.random.normal(kw, (Cin, Cout, 4, 4), jnp.float32)
    gamma = 1.0 + 0.1 * jax.random.normal(kg, (Cout,), jnp.float32)
    beta = 0.1 * jax.random.normal(kb, (Cout,), jnp.float32)

    # row_tile=8 -> pass-1 grid (2 batches x 2 row tiles): exercises the pipeline.
    y = block_forward(x, weight, gamma, beta, row_tile=8)
    y = jax.block_until_ready(y)
    assert y.shape == (N, Cout, 2 * H, 2 * W), y.shape

    ref = reference_block(np.asarray(x), np.asarray(weight),
                          np.asarray(gamma), np.asarray(beta))
    np.testing.assert_allclose(np.asarray(y), ref, rtol=2e-3, atol=2e-3)
    print("KERNEL_OK")
</pallas_src>

<mosaic_0001>
module attributes {stable_mosaic.version = 11 : i64} {
  func.func @_deconv_stats_kernel(%arg0: i32, %arg1: i32, %arg2: memref<1x17x17x16xbf16, #tpu.memory_space<vmem>>, %arg3: memref<2x2x16x8xbf16, #tpu.memory_space<vmem>>, %arg4: memref<1x8x2x16x16xf32, #tpu.memory_space<vmem>>, %arg5: memref<1x1x2x8xf32, #tpu.memory_space<vmem>>) attributes {dimension_semantics = [#tpu.dimension_semantics<parallel>, #tpu.dimension_semantics<parallel>], iteration_bounds = array<i64: 2, 2>, scalar_prefetch = 0 : i64, scratch_operands = 0 : i64, tpu.core_type = #tpu.core_type<tc>, window_params = [{transform_indices = @transform_0, window_bounds = array<i64: 1, 17, 17, 16>}, {pipeline_mode = #tpu.pipeline_mode<synchronous>, transform_indices = @transform_1, window_bounds = array<i64: 2, 2, 16, 8>}, {transform_indices = @transform_2, window_bounds = array<i64: 1, 8, 2, 16, 16>}, {transform_indices = @transform_3, window_bounds = array<i64: 1, 1, 2, 8>}]} {
    %c8_i32 = arith.constant 8 : i32
    %0 = arith.muli %arg1, %c8_i32 : i32
    %1 = tpu.assume_multiple %0, 8 : i32
    %cst = arith.constant 0.000000e+00 : f32
    %2 = vector.broadcast %cst : f32 to vector<1x8xf32>
    %cst_0 = arith.constant 0.000000e+00 : f32
    %3 = vector.broadcast %cst_0 : f32 to vector<1x8xf32>
    %c0_i32 = arith.constant 0 : i32
    %4 = arith.addi %1, %c0_i32 : i32
    %c0 = arith.constant 0 : index
    %5 = arith.index_cast %4 : i32 to index
    %c0_1 = arith.constant 0 : index
    %c0_2 = arith.constant 0 : index
    %6 = vector.load %arg2[%c0, %5, %c0_1, %c0_2] : memref<1x17x17x16xbf16, #tpu.memory_space<vmem>>, vector<1x8x16x16xbf16>
    %7 = vector.shape_cast %6 : vector<1x8x16x16xbf16> to vector<8x16x16xbf16>
    %8 = vector.shape_cast %7 : vector<8x16x16xbf16> to vector<128x16xbf16>
    %c0_3 = arith.constant 0 : index
    %c0_4 = arith.constant 0 : index
    %c0_5 = arith.constant 0 : index
    %c0_6 = arith.constant 0 : index
    %9 = vector.load %arg3[%c0_3, %c0_4, %c0_5, %c0_6] : memref<2x2x16x8xbf16, #tpu.memory_space<vmem>>, vector<1x1x16x8xbf16>
    %10 = vector.shape_cast %9 : vector<1x1x16x8xbf16> to vector<16x8xbf16>
    %cst_7 = arith.constant dense<0.000000e+00> : vector<128x8xf32>
    %11 = tpu.matmul %8, %10, %cst_7 {dimension_numbers = #tpu.dot_dimension_numbers<[1], [0], [0], [1], [0, 0, 1, 1], [], []>} : vector<128x16xbf16>, vector<16x8xbf16>, vector<128x8xf32> -> vector<128x8xf32>
    %cst_8 = arith.constant dense<0.000000e+00> : vector<8xf32>
    %12 = vector.multi_reduction <add>, %11, %cst_8 [0] : vector<128x8xf32> to vector<8xf32>
    %13 = vector.shape_cast %12 : vector<8xf32> to vector<1x8xf32>
    %14 = arith.addf %2, %13 : vector<1x8xf32>
    %15 = arith.mulf %11, %11 : vector<128x8xf32>
    %cst_9 = arith.constant dense<0.000000e+00> : vector<8xf32>
    %16 = vector.multi_reduction <add>, %15, %cst_9 [0] : vector<128x8xf32> to vector<8xf32>
    %17 = vector.shape_cast %16 : vector<8xf32> to vector<1x8xf32>
    %18 = arith.addf %3, %17 : vector<1x8xf32>
    %19 = vector.shape_cast %11 : vector<128x8xf32> to vector<8x16x8xf32>
    %c0_10 = arith.constant 0 : index
    %c0_11 = arith.constant 0 : index
    %c0_12 = arith.constant 0 : index
    %c0_13 = arith.constant 0 : index
    %c0_14 = arith.constant 0 : index
    %20 = vector.load %arg4[%c0_10, %c0_11, %c0_12, %c0_13, %c0_14] : memref<1x8x2x16x16xf32, #tpu.memory_space<vmem>>, vector<1x8x1x16x8xf32>
    %21 = vector.shape_cast %20 : vector<1x8x1x16x8xf32> to vector<8x16x8xf32>
    %22 = vector.shape_cast %19 : vector<8x16x8xf32> to vector<1x8x1x16x8xf32>
    tpu.vector_store %arg4[%c0_10, %c0_11, %c0_12, %c0_13, %c0_14], %22 {strides = array<i32>} : memref<1x8x2x16x16xf32, #tpu.memory_space<vmem>>, vector<1x8x1x16x8xf32>,
    %c0_i32_15 = arith.constant 0 : i32
    %23 = arith.addi %1, %c0_i32_15 : i32
    %c0_16 = arith.constant 0 : index
    %24 = arith.index_cast %23 : i32 to index
    %c1 = arith.constant 1 : index
    %c0_17 = arith.constant 0 : index
    %25 = vector.load %arg2[%c0_16, %24, %c1, %c0_17] : memref<1x17x17x16xbf16, #tpu.memory_space<vmem>>, vector<1x8x16x16xbf16>
    %26 = vector.shape_cast %25 : vector<1x8x16x16xbf16> to vector<8x16x16xbf16>
    %27 = vector.shape_cast %26 : vector<8x16x16xbf16> to vector<128x16xbf16>
    %c0_18 = arith.constant 0 : index
    %c1_19 = arith.constant 1 : index
    %c0_20 = arith.constant 0 : index
    %c0_21 = arith.constant 0 : index
    %28 = vector.load %arg3[%c0_18, %c1_19, %c0_20, %c0_21] : memref<2x2x16x8xbf16, #tpu.memory_space<vmem>>, vector<1x1x16x8xbf16>
    %29 = vector.shape_cast %28 : vector<1x1x16x8xbf16> to vector<16x8xbf16>
    %cst_22 = arith.constant dense<0.000000e+00> : vector<128x8xf32>
    %30 = tpu.matmul %27, %29, %cst_22 {dimension_numbers = #tpu.dot_dimension_numbers<[1], [0], [0], [1], [0, 0, 1, 1], [], []>} : vector<128x16xbf16>, vector<16x8xbf16>, vector<128x8xf32> -> vector<128x8xf32>
    %cst_23 = arith.constant dense<0.000000e+00> : vector<8xf32>
    %31 = vector.multi_reduction <add>, %30, %cst_23 [0] : vector<128x8xf32> to vector<8xf32>
    %32 = vector.shape_cast %31 : vector<8xf32> to vector<1x8xf32>
    %33 = arith.addf %14, %32 : vector<1x8xf32>
    %34 = arith.mulf %30, %30 : vector<128x8xf32>
    %cst_24 = arith.constant dense<0.000000e+00> : vector<8xf32>
    %35 = vector.multi_reduction <add>, %34, %cst_24 [0] : vector<128x8xf32> to vector<8xf32>
    %36 = vector.shape_cast %35 : vector<8xf32> to vector<1x8xf32>
    %37 = arith.addf %18, %36 : vector<1x8xf32>
    %38 = vector.shape_cast %30 : vector<128x8xf32> to vector<8x16x8xf32>
    %c0_25 = arith.constant 0 : index
    %c0_26 = arith.constant 0 : index
    %c0_27 = arith.constant 0 : index
    %c0_28 = arith.constant 0 : index
    %c8 = arith.constant 8 : index
    %39 = vector.load %arg4[%c0_25, %c0_26, %c0_27, %c0_28, %c8] : memref<1x8x2x16x16xf32, #tpu.memory_space<vmem>>, vector<1x8x1x16x8xf32>
    %40 = vector.shape_cast %39 : vector<1x8x1x16x8xf32> to vector<8x16x8xf32>
    %41 = vector.shape_cast %38 : vector<8x16x8xf32> to vector<1x8x1x16x8xf32>
    tpu.vector_store %arg4[%c0_25, %c0_26, %c0_27, %c0_28, %c8], %41 {strides = array<i32>} : memref<1x8x2x16x16xf32, #tpu.memory_space<vmem>>, vector<1x8x1x16x8xf32>,
    %c1_i32 = arith.constant 1 : i32
    %42 = arith.addi %1, %c1_i32 : i32
    %c0_29 = arith.constant 0 : index
    %43 = arith.index_cast %42 : i32 to index
    %c0_30 = arith.constant 0 : index
    %c0_31 = arith.constant 0 : index
    %44 = vector.load %arg2[%c0_29, %43, %c0_30, %c0_31] : memref<1x17x17x16xbf16, #tpu.memory_space<vmem>>, vector<1x8x16x16xbf16>
    %45 = vector.shape_cast %44 : vector<1x8x16x16xbf16> to vector<8x16x16xbf16>
    %46 = vector.shape_cast %45 : vector<8x16x16xbf16> to vector<128x16xbf16>
    %c1_32 = arith.constant 1 : index
    %c0_33 = arith.constant 0 : index
    %c0_34 = arith.constant 0 : index
    %c0_35 = arith.constant 0 : index
    %47 = vector.load %arg3[%c1_32, %c0_33, %c0_34, %c0_35] : memref<2x2x16x8xbf16, #tpu.memory_space<vmem>>, vector<1x1x16x8xbf16>
    %48 = vector.shape_cast %47 : vector<1x1x16x8xbf16> to vector<16x8xbf16>
    %cst_36 = arith.constant dense<0.000000e+00> : vector<128x8xf32>
    %49 = tpu.matmul %46, %48, %cst_36 {dimension_numbers = #tpu.dot_dimension_numbers<[1], [0], [0], [1], [0, 0, 1, 1], [], []>} : vector<128x16xbf16>, vector<16x8xbf16>, vector<128x8xf32> -> vector<128x8xf32>
    %cst_37 = arith.constant dense<0.000000e+00> : vector<8xf32>
    %50 = vector.multi_reduction <add>, %49, %cst_37 [0] : vector<128x8xf32> to vector<8xf32>
    %51 = vector.shape_cast %50 : vector<8xf32> to vector<1x8xf32>
    %52 = arith.addf %33, %51 : vector<1x8xf32>
    %53 = arith.mulf %49, %49 : vector<128x8xf32>
    %cst_38 = arith.constant dense<0.000000e+00> : vector<8xf32>
    %54 = vector.multi_reduction <add>, %53, %cst_38 [0] : vector<128x8xf32> to vector<8xf32>
    %55 = vector.shape_cast %54 : vector<8xf32> to vector<1x8xf32>
    %56 = arith.addf %37, %55 : vector<1x8xf32>
    %57 = vector.shape_cast %49 : vector<128x8xf32> to vector<8x16x8xf32>
    %c0_39 = arith.constant 0 : index
    %c0_40 = arith.constant 0 : index
    %c1_41 = arith.constant 1 : index
    %c0_42 = arith.constant 0 : index
    %c0_43 = arith.constant 0 : index
    %58 = vector.load %arg4[%c0_39, %c0_40, %c1_41, %c0_42, %c0_43] : memref<1x8x2x16x16xf32, #tpu.memory_space<vmem>>, vector<1x8x1x16x8xf32>
    %59 = vector.shape_cast %58 : vector<1x8x1x16x8xf32> to vector<8x16x8xf32>
    %60 = vector.shape_cast %57 : vector<8x16x8xf32> to vector<1x8x1x16x8xf32>
    tpu.vector_store %arg4[%c0_39, %c0_40, %c1_41, %c0_42, %c0_43], %60 {strides = array<i32>} : memref<1x8x2x16x16xf32, #tpu.memory_space<vmem>>, vector<1x8x1x16x8xf32>,
    %c1_i32_44 = arith.constant 1 : i32
    %61 = arith.addi %1, %c1_i32_44 : i32
    %c0_45 = arith.constant 0 : index
    %62 = arith.index_cast %61 : i32 to index
    %c1_46 = arith.constant 1 : index
    %c0_47 = arith.constant 0 : index
    %63 = vector.load %arg2[%c0_45, %62, %c1_46, %c0_47] : memref<1x17x17x16xbf16, #tpu.memory_space<vmem>>, vector<1x8x16x16xbf16>
    %64 = vector.shape_cast %63 : vector<1x8x16x16xbf16> to vector<8x16x16xbf16>
    %65 = vector.shape_cast %64 : vector<8x16x16xbf16> to vector<128x16xbf16>
    %c1_48 = arith.constant 1 : index
    %c1_49 = arith.constant 1 : index
    %c0_50 = arith.constant 0 : index
    %c0_51 = arith.constant 0 : index
    %66 = vector.load %arg3[%c1_48, %c1_49, %c0_50, %c0_51] : memref<2x2x16x8xbf16, #tpu.memory_space<vmem>>, vector<1x1x16x8xbf16>
    %67 = vector.shape_cast %66 : vector<1x1x16x8xbf16> to vector<16x8xbf16>
    %cst_52 = arith.constant dense<0.000000e+00> : vector<128x8xf32>
    %68 = tpu.matmul %65, %67, %cst_52 {dimension_numbers = #tpu.dot_dimension_numbers<[1], [0], [0], [1], [0, 0, 1, 1], [], []>} : vector<128x16xbf16>, vector<16x8xbf16>, vector<128x8xf32> -> vector<128x8xf32>
    %cst_53 = arith.constant dense<0.000000e+00> : vector<8xf32>
    %69 = vector.multi_reduction <add>, %68, %cst_53 [0] : vector<128x8xf32> to vector<8xf32>
    %70 = vector.shape_cast %69 : vector<8xf32> to vector<1x8xf32>
    %71 = arith.addf %52, %70 : vector<1x8xf32>
    %72 = arith.mulf %68, %68 : vector<128x8xf32>
    %cst_54 = arith.constant dense<0.000000e+00> : vector<8xf32>
    %73 = vector.multi_reduction <add>, %72, %cst_54 [0] : vector<128x8xf32> to vector<8xf32>
    %74 = vector.shape_cast %73 : vector<8xf32> to vector<1x8xf32>
    %75 = arith.addf %56, %74 : vector<1x8xf32>
    %76 = vector.shape_cast %68 : vector<128x8xf32> to vector<8x16x8xf32>
    %c0_55 = arith.constant 0 : index
    %c0_56 = arith.constant 0 : index
    %c1_57 = arith.constant 1 : index
    %c0_58 = arith.constant 0 : index
    %c8_59 = arith.constant 8 : index
    %77 = vector.load %arg4[%c0_55, %c0_56, %c1_57, %c0_58, %c8_59] : memref<1x8x2x16x16xf32, #tpu.memory_space<vmem>>, vector<1x8x1x16x8xf32>
    %78 = vector.shape_cast %77 : vector<1x8x1x16x8xf32> to vector<8x16x8xf32>
    %79 = vector.shape_cast %76 : vector<8x16x8xf32> to vector<1x8x1x16x8xf32>
    tpu.vector_store %arg4[%c0_55, %c0_56, %c1_57, %c0_58, %c8_59], %79 {strides = array<i32>} : memref<1x8x2x16x16xf32, #tpu.memory_space<vmem>>, vector<1x8x1x16x8xf32>,
    %c0_60 = arith.constant 0 : index
    %c0_61 = arith.constant 0 : index
    %c0_62 = arith.constant 0 : index
    %c0_63 = arith.constant 0 : index
    %80 = vector.load %arg5[%c0_60, %c0_61, %c0_62, %c0_63] : memref<1x1x2x8xf32, #tpu.memory_space<vmem>>, vector<1x1x1x8xf32>
    %81 = vector.shape_cast %80 : vector<1x1x1x8xf32> to vector<1x8xf32>
    %82 = vector.shape_cast %71 : vector<1x8xf32> to vector<1x1x1x8xf32>
    tpu.vector_store %arg5[%c0_60, %c0_61, %c0_62, %c0_63], %82 {strides = array<i32>} : memref<1x1x2x8xf32, #tpu.memory_space<vmem>>, vector<1x1x1x8xf32>,
    %c0_64 = arith.constant 0 : index
    %c0_65 = arith.constant 0 : index
    %c1_66 = arith.constant 1 : index
    %c0_67 = arith.constant 0 : index
    %83 = vector.load %arg5[%c0_64, %c0_65, %c1_66, %c0_67] : memref<1x1x2x8xf32, #tpu.memory_space<vmem>>, vector<1x1x1x8xf32>
    %84 = vector.shape_cast %83 : vector<1x1x1x8xf32> to vector<1x8xf32>
    %85 = vector.shape_cast %75 : vector<1x8xf32> to vector<1x1x1x8xf32>
    tpu.vector_store %arg5[%c0_64, %c0_65, %c1_66, %c0_67], %85 {strides = array<i32>} : memref<1x1x2x8xf32, #tpu.memory_space<vmem>>, vector<1x1x1x8xf32>,
    return
  }
  func.func @transform_0(%arg0: i32, %arg1: i32) -> (i32, i32, i32, i32) {
    %c0_i32 = arith.constant 0 : i32
    %c0_i32_0 = arith.constant 0 : i32
    %c0_i32_1 = arith.constant 0 : i32
    %c0_i32_2 = arith.constant 0 : i32
    return %arg0, %c0_i32, %c0_i32_0, %c0_i32_1 : i32, i32, i32, i32
  }
  func.func @transform_1(%arg0: i32, %arg1: i32) -> (i32, i32, i32, i32) {
    %c0_i32 = arith.constant 0 : i32
    %c0_i32_0 = arith.constant 0 : i32
    %c0_i32_1 = arith.constant 0 : i32
    %c0_i32_2 = arith.constant 0 : i32
    %c0_i32_3 = arith.constant 0 : i32
    return %c0_i32, %c0_i32_0, %c0_i32_1, %c0_i32_2 : i32, i32, i32, i32
  }
  func.func @transform_2(%arg0: i32, %arg1: i32) -> (i32, i32, i32, i32, i32) {
    %c0_i32 = arith.constant 0 : i32
    %c0_i32_0 = arith.constant 0 : i32
    %c0_i32_1 = arith.constant 0 : i32
    %c0_i32_2 = arith.constant 0 : i32
    return %arg0, %arg1, %c0_i32, %c0_i32_0, %c0_i32_1 : i32, i32, i32, i32, i32
  }
  func.func @transform_3(%arg0: i32, %arg1: i32) -> (i32, i32, i32, i32) {
    %c0_i32 = arith.constant 0 : i32
    %c0_i32_0 = arith.constant 0 : i32
    %c0_i32_1 = arith.constant 0 : i32
    return %arg0, %arg1, %c0_i32, %c0_i32_0 : i32, i32, i32, i32
  }
}

module attributes {stable_mosaic.version = 11 : i64} {
  func.func @_bn_lrelu_kernel(%arg0: i32, %arg1: i32, %arg2: memref<1x16x32x8xf32, #tpu.memory_space<vmem>>, %arg3: memref<1x8xf32, #tpu.memory_space<vmem>>, %arg4: memref<1x8xf32, #tpu.memory_space<vmem>>, %arg5: memref<1x16x32x8xf32, #tpu.memory_space<vmem>>) attributes {dimension_semantics = [#tpu.dimension_semantics<parallel>, #tpu.dimension_semantics<parallel>], iteration_bounds = array<i64: 2, 2>, scalar_prefetch = 0 : i64, scratch_operands = 0 : i64, tpu.core_type = #tpu.core_type<tc>, window_params = [{transform_indices = @transform_0, window_bounds = array<i64: 1, 16, 32, 8>}, {pipeline_mode = #tpu.pipeline_mode<synchronous>, transform_indices = @transform_1, window_bounds = array<i64: 1, 8>}, {pipeline_mode = #tpu.pipeline_mode<synchronous>, transform_indices = @transform_2, window_bounds = array<i64: 1, 8>}, {transform_indices = @transform_3, window_bounds = array<i64: 1, 16, 32, 8>}]} {
    %c0 = arith.constant 0 : index
    %c0_0 = arith.constant 0 : index
    %c0_1 = arith.constant 0 : index
    %c0_2 = arith.constant 0 : index
    %0 = vector.load %arg2[%c0, %c0_0, %c0_1, %c0_2] : memref<1x16x32x8xf32, #tpu.memory_space<vmem>>, vector<1x16x32x8xf32>
    %1 = vector.shape_cast %0 : vector<1x16x32x8xf32> to vector<16x32x8xf32>
    %c0_3 = arith.constant 0 : index
    %c0_4 = arith.constant 0 : index
    %2 = vector.load %arg3[%c0_3, %c0_4] : memref<1x8xf32, #tpu.memory_space<vmem>>, vector<1x8xf32>
    %3 = vector.shape_cast %2 : vector<1x8xf32> to vector<1x1x8xf32>
    %4 = vector.broadcast %3 : vector<1x1x8xf32> to vector<16x32x8xf32>
    %5 = arith.mulf %1, %4 : vector<16x32x8xf32>
    %c0_5 = arith.constant 0 : index
    %c0_6 = arith.constant 0 : index
    %6 = vector.load %arg4[%c0_5, %c0_6] : memref<1x8xf32, #tpu.memory_space<vmem>>, vector<1x8xf32>
    %7 = vector.shape_cast %6 : vector<1x8xf32> to vector<1x1x8xf32>
    %8 = vector.broadcast %7 : vector<1x1x8xf32> to vector<16x32x8xf32>
    %9 = arith.addf %5, %8 : vector<16x32x8xf32>
    %cst = arith.constant 0.000000e+00 : f32
    %10 = vector.broadcast %cst : f32 to vector<16x32x8xf32>
    %11 = arith.cmpf oge, %9, %10 : vector<16x32x8xf32>
    %cst_7 = arith.constant 2.000000e-01 : f32
    %12 = vector.broadcast %cst_7 : f32 to vector<16x32x8xf32>
    %13 = arith.mulf %12, %9 : vector<16x32x8xf32>
    %14 = arith.select %11, %9, %13 : vector<16x32x8xi1>, vector<16x32x8xf32>
    %c0_8 = arith.constant 0 : index
    %c0_9 = arith.constant 0 : index
    %c0_10 = arith.constant 0 : index
    %c0_11 = arith.constant 0 : index
    %15 = vector.load %arg5[%c0_8, %c0_9, %c0_10, %c0_11] : memref<1x16x32x8xf32, #tpu.memory_space<vmem>>, vector<1x16x32x8xf32>
    %16 = vector.shape_cast %15 : vector<1x16x32x8xf32> to vector<16x32x8xf32>
    %17 = vector.shape_cast %14 : vector<16x32x8xf32> to vector<1x16x32x8xf32>
    tpu.vector_store %arg5[%c0_8, %c0_9, %c0_10, %c0_11], %17 {strides = array<i32>} : memref<1x16x32x8xf32, #tpu.memory_space<vmem>>, vector<1x16x32x8xf32>,
    return
  }
  func.func @transform_0(%arg0: i32, %arg1: i32) -> (i32, i32, i32, i32) {
    %c0_i32 = arith.constant 0 : i32
    %c0_i32_0 = arith.constant 0 : i32
    %c0_i32_1 = arith.constant 0 : i32
    return %arg0, %arg1, %c0_i32, %c0_i32_0 : i32, i32, i32, i32
  }
  func.func @transform_1(%arg0: i32, %arg1: i32) -> (i32, i32) {
    %c0_i32 = arith.constant 0 : i32
    %c0_i32_0 = arith.constant 0 : i32
    %c0_i32_1 = arith.constant 0 : i32
    return %c0_i32, %c0_i32_0 : i32, i32
  }
  func.func @transform_2(%arg0: i32, %arg1: i32) -> (i32, i32) {
    %c0_i32 = arith.constant 0 : i32
    %c0_i32_0 = arith.constant 0 : i32
    %c0_i32_1 = arith.constant 0 : i32
    return %c0_i32, %c0_i32_0 : i32, i32
  }
  func.func @transform_3(%arg0: i32, %arg1: i32) -> (i32, i32, i32, i32) {
    %c0_i32 = arith.constant 0 : i32
    %c0_i32_0 = arith.constant 0 : i32
    %c0_i32_1 = arith.constant 0 : i32
    return %arg0, %arg1, %c0_i32, %c0_i32_0 : i32, i32, i32, i32
  }
}

</mosaic_0001>

<bundles_post_ra>
// kernel: block_forward.3
= control target key start
LH: loop header
LB: loop body
LE: loop exit
PB: predicated region body
PF: predicated region fallthrough
CT: control target
= control target key end

     0   :  { %s894_s12 = smov 0   ;;  %s896_s13 = smov 0   ;;  %s1457_s0 = inlined_call_operand.vmem [shape: f32[2,32,32,8], index: 0, kind: input, shape index: {}, may-alias: {0,3}]   ;;  %s1458_s1 = inlined_call_operand.vmem [shape: f32[1,8], index: 1, kind: input, shape index: {}]   ;;  %s1459_s2 = inlined_call_operand.vmem [shape: f32[1,8], index: 2, kind: input, shape index: {}]   ;;  %s1460_s3 = inlined_call_operand.vmem [shape: f32[2,32,32,8], index: 3, kind: output, shape index: {}, may-alias: {0,3}]  }
   0x1   :  { %s898_s14 = smov 0   ;;  %s900_s15 = smov 0  }
   0x2   :  { %s902_s16 = smov 0  }
   0x3 LB: > { %s22_s17 = sadd.s32 1, %s864_s14  ;;  %s25_s18 = sadd.s32 1, %s868_s15  ;;  %s872_s16 = sphi %s902_s16, %s13_s16   ;;  %s868_s15 = sphi %s900_s15, %s1478_s15   ;;  %s864_s14 = sphi %s898_s14, %s1477_s14   ;;  %s860_s13 = sphi %s896_s13, %s1476_s13   ;;  %s856_s12 = sphi %s894_s12, %s1475_s12  }
   0x4   : > { %p23_p0 = scmp.ge.s32.totalorder %s22_s17, 2  ;;  %p781_p1 = scmp.ge.s32.totalorder %s872_s16, 1 }
   0x5   : > { %p159_p2 = scmp.lt.s32.totalorder %s872_s16, 5 }
   0x6   : > { %s1480_s17 = smov (%p23_p0, %s22_s17), 0  ;;  %s1482_s18 = smov (!%p23_p0, %s25_s18), %s868_s15 }
   0x7   : > { %p160_p3 = pnand %p781_p1, %p159_p2  ;;  %p27_p4 = scmp.ge.s32.totalorder %s1482_s18, 2 }
   0x9   : > { %s1484_s18 = smov (%p27_p4, %s1482_s18), 0  ;;  %163 = sbr.rel (%p160_p3) target bundleno = 110 (0x6e), region = 32 }
  0x10   : > { %s782_s19 = sshll.u32 %s856_s12, 4  ;;  %p194_p5 = scmp.lt.s32.totalorder %s860_s13, 1  ;;  %v930_v0 = vld [vmem:[%s1458_s1] ss:$0 sm:$0xff]  ;;  %vm613_vm6 = vcmask 64512  }
  0x11   : > { %p196_p6 = scmp.lt.s32.totalorder %s782_s19, 31  ;;  %v942_v1 = vld [vmem:[%s1459_s2] ss:$0 sm:$0xff] }
  0x12   : > { %s1486_s13 = smov (!%p194_p5, %s860_s13), 1 }
  0x13   : > { %s1488_s19 = smov (!%p196_p6, %s782_s19), 31  ;;  %s784_s20 = sshll.u32 %s1486_s13, 7 }
  0x14   : > { %s783_s21 = sshll.u32 %s1488_s19, 2 }
  0x15   : > { %s924_s22 = sadd.s32 %s784_s20, %s783_s21 }
  0x16   : > { %s785_s23 = sshll.u32 %s924_s22, 3 }
  0x17   : > { %s937_s28 = scalar_lea.vmem %s1457_s0, %s785_s23  ;;  %s1023_s6 = scalar_lea.vmem %s1460_s3, %s785_s23 }
  0x18   : > { %v215_v2 = vld [vmem:[%s937_s28] sm:$0xff]  ;;  %v216_v3 = vld [vmem:[%s937_s28 + $0x8] sm:$0xff]  ;;  %v217_v4 = vld [vmem:[%s937_s28 + $0x10] sm:$0xff] }
  0x19   : > { %v218_v5 = vld [vmem:[%s937_s28 + $0x18] sm:$0xff]  ;;  %v219_v6 = vld [vmem:[%s937_s28 + $0x20] sm:$0xff]  ;;  %v220_v7 = vld [vmem:[%s937_s28 + $0x28] sm:$0xff]  ;;  %v286_v8 = vmul.f32 %v930_v0, %v215_v2  ;;  %v287_v9 = vmul.f32 %v930_v0, %v216_v3  ;;  %v288_v10 = vmul.f32 %v930_v0, %v217_v4 }
  0x1a   : > { %v221_v11 = vld [vmem:[%s937_s28 + $0x30] sm:$0xff]  ;;  %v222_v12 = vld [vmem:[%s937_s28 + $0x38] sm:$0xff]  ;;  %v223_v13 = vld [vmem:[%s937_s28 + $0x40] sm:$0xff]  ;;  %v289_v14 = vmul.f32 %v930_v0, %v218_v5  ;;  %v290_v15 = vmul.f32 %v930_v0, %v219_v6  ;;  %v291_v16 = vmul.f32 %v930_v0, %v220_v7 }
  0x1b   : > { %v224_v17 = vld [vmem:[%s937_s28 + $0x48] sm:$0xff]  ;;  %v357_v18 = vadd.f32 %v942_v1, %v286_v8  ;;  %v358_v19 = vadd.f32 %v942_v1, %v287_v9  ;;  %v359_v20 = vadd.f32 %v942_v1, %v288_v10  ;;  %v292_v21 = vmul.f32 %v930_v0, %v221_v11  ;;  %v225_v29 = vld [vmem:[%s937_s28 + $0x50] sm:$0xff]  ;;  %v226_v33 = vld [vmem:[%s937_s28 + $0x58] sm:$0xff] }
  0x1c   : > { %v360_v22 = vadd.f32 %v942_v1, %v289_v14  ;;  %v361_v23 = vadd.f32 %v942_v1, %v290_v15  ;;  %v362_v24 = vadd.f32 %v942_v1, %v291_v16  ;;  %v293_v25 = vmul.f32 %v930_v0, %v222_v12  ;;  %v227_v43 = vld [vmem:[%s937_s28 + $0x60] sm:$0xff]  ;;  %v228_v47 = vld [vmem:[%s937_s28 + $0x68] sm:$0xff]  ;;  %v229_v57 = vld [vmem:[%s937_s28 + $0x70] sm:$0xff] }
  0x1d   : > { %vm421_vm0 = vcmp.ge.f32.partialorder %v357_v18, 0.0  ;;  %v485_v26 = vmul.f32 0.2, %v357_v18  ;;  %v363_v27 = vadd.f32 %v942_v1, %v292_v21  ;;  %v294_v28 = vmul.f32 %v930_v0, %v223_v13  ;;  %v230_v61 = vld [vmem:[%s937_s28 + $0x78] sm:$0xff]  ;;  %v231_v3 = vld [vmem:[%s937_s28 + $0x80] sm:$0xff]  ;;  %v232_v4 = vld [vmem:[%s937_s28 + $0x88] sm:$0xff] }
  0x1e   : > { %vm422_vm1 = vcmp.ge.f32.partialorder %v358_v19, 0.0  ;;  %v486_v30 = vmul.f32 0.2, %v358_v19  ;;  %v364_v31 = vadd.f32 %v942_v1, %v293_v25  ;;  %v295_v32 = vmul.f32 %v930_v0, %v224_v17  ;;  %v233_v8 = vld [vmem:[%s937_s28 + $0x90] sm:$0xff]  ;;  %v234_v9 = vld [vmem:[%s937_s28 + $0x98] sm:$0xff]  ;;  %v1026_v16 = vld [vmem:[%s937_s28 + $0xa0] sm:$0xff] }
  0x1f   : > { %v974_v34 = vsel %vm421_vm0, %v357_v18, %v485_v26  ;;  %vm423_vm2 = vcmp.ge.f32.partialorder %v359_v20, 0.0  ;;  %v487_v35 = vmul.f32 0.2, %v359_v20  ;;  %v365_v36 = vadd.f32 %v942_v1, %v294_v28  ;;  %v1029_v17 = vld [vmem:[%s937_s28 + $0xa8] sm:$0xff]  ;;  %v1032_v18 = vld [vmem:[%s937_s28 + $0xb0] sm:$0xff]  ;;  %v1062_v28 = vld [vmem:[%s937_s28 + $0x100] sm:$0xff] }
  0x20   : > { %v977_v37 = vsel %vm422_vm1, %v358_v19, %v486_v30  ;;  %vm424_vm3 = vcmp.ge.f32.partialorder %v360_v22, 0.0  ;;  %v488_v38 = vmul.f32 0.2, %v360_v22  ;;  %v366_v39 = vadd.f32 %v942_v1, %v295_v32  ;;  %v1035_v19 = vld [vmem:[%s937_s28 + $0xb8] sm:$0xff]  ;;  %v1041_v21 = vld [vmem:[%s937_s28 + $0xc8] sm:$0xff]  ;;  %v1056_v26 = vld [vmem:[%s937_s28 + $0xf0] sm:$0xff] }
  0x21   : > { %v980_v40 = vsel %vm423_vm2, %v359_v20, %v487_v35  ;;  %vm425_vm4 = vcmp.ge.f32.partialorder %v361_v23, 0.0  ;;  %v489_v41 = vmul.f32 0.2, %v361_v23  ;;  %v296_v42 = vmul.f32 %v930_v0, %v225_v29  ;;  %v1038_v20 = vld [vmem:[%s937_s28 + $0xc0] sm:$0xff]  ;;  %v1053_v25 = vld [vmem:[%s937_s28 + $0xe8] sm:$0xff]  ;;  %v1068_v30 = vld [vmem:[%s937_s28 + $0x110] sm:$0xff] }
  0x22   : > { %v984_v44 = vsel %vm424_vm3, %v360_v22, %v488_v38  ;;  %vm426_vm5 = vcmp.ge.f32.partialorder %v362_v24, 0.0  ;;  %v490_v45 = vmul.f32 0.2, %v362_v24  ;;  %v297_v46 = vmul.f32 %v930_v0, %v226_v33  ;;  %v1044_v22 = vld [vmem:[%s937_s28 + $0xd0] sm:$0xff]  ;;  %v1065_v29 = vld [vmem:[%s937_s28 + $0x108] sm:$0xff]  ;;  %v1074_v32 = vld [vmem:[%s937_s28 + $0x120] sm:$0xff] }
  0x23   : > { %v988_v48 = vsel %vm425_vm4, %v361_v23, %v489_v41  ;;  %vm427_vm7 = vcmp.ge.f32.partialorder %v363_v27, 0.0  ;;  %v491_v49 = vmul.f32 0.2, %v363_v27  ;;  %v367_v50 = vadd.f32 %v942_v1, %v296_v42  ;;  %v1047_v23 = vld [vmem:[%s937_s28 + $0xd8] sm:$0xff]  ;;  %v1077_v33 = vld [vmem:[%s937_s28 + $0x128] sm:$0xff]  ;;  %v1080_v35 = vld [vmem:[%s937_s28 + $0x130] sm:$0xff] }
  0x24   : > { %v991_v51 = vsel %vm426_vm5, %v362_v24, %v490_v45  ;;  %vm428_vm8 = vcmp.ge.f32.partialorder %v364_v31, 0.0  ;;  %v492_v52 = vmul.f32 0.2, %v364_v31  ;;  %v368_v53 = vadd.f32 %v942_v1, %v297_v46  ;;  %v1050_v24 = vld [vmem:[%s937_s28 + $0xe0] sm:$0xff]  ;;  %v1092_v41 = vld [vmem:[%s937_s28 + $0x150] sm:$0xff]  ;;  %v1095_v42 = vld [vmem:[%s937_s28 + $0x158] sm:$0xff] }
  0x25   : > { %v994_v54 = vsel %vm427_vm7, %v363_v27, %v491_v49  ;;  %vm429_vm9 = vcmp.ge.f32.partialorder %v365_v36, 0.0  ;;  %v493_v55 = vmul.f32 0.2, %v365_v36  ;;  %v298_v56 = vmul.f32 %v930_v0, %v227_v43  ;;  %v1059_v27 = vld [vmem:[%s937_s28 + $0xf8] sm:$0xff]  ;;  %v1086_v38 = vld [vmem:[%s937_s28 + $0x140] sm:$0xff]  ;;  %v1101_v45 = vld [vmem:[%s937_s28 + $0x168] sm:$0xff] }
  0x26   : > { %v998_v58 = vsel %vm428_vm8, %v364_v31, %v492_v52  ;;  %vm430_vm10 = vcmp.ge.f32.partialorder %v366_v39, 0.0  ;;  %v494_v59 = vmul.f32 0.2, %v366_v39  ;;  %v299_v60 = vmul.f32 %v930_v0, %v228_v47  ;;  %v1071_v31 = vld [vmem:[%s937_s28 + $0x118] sm:$0xff]  ;;  %v1098_v43 = vld [vmem:[%s937_s28 + $0x160] sm:$0xff]  ;;  %v1104_v46 = vld [vmem:[%s937_s28 + $0x170] sm:$0xff] }
  0x27   : > { %v1002_v62 = vsel %vm429_vm9, %v365_v36, %v493_v55  ;;  %vm431_vm11 = vcmp.ge.f32.partialorder %v367_v50, 0.0  ;;  %v495_v63 = vmul.f32 0.2, %v367_v50  ;;  %v369_v2 = vadd.f32 %v942_v1, %v298_v56  ;;  %v1083_v36 = vld [vmem:[%s937_s28 + $0x138] sm:$0xff]  ;;  %v1110_v49 = vld [vmem:[%s937_s28 + $0x180] sm:$0xff]  ;;  %v1116_v52 = vld [vmem:[%s937_s28 + $0x190] sm:$0xff] }
  0x28   : > { %v1007_v5 = vsel %vm430_vm10, %v366_v39, %v494_v59  ;;  %vm432_vm12 = vcmp.ge.f32.partialorder %v368_v53, 0.0  ;;  %v496_v6 = vmul.f32 0.2, %v368_v53  ;;  %v370_v7 = vadd.f32 %v942_v1, %v299_v60  ;;  %v1089_v39 = vld [vmem:[%s937_s28 + $0x148] sm:$0xff]  ;;  %v1107_v47 = vld [vmem:[%s937_s28 + $0x178] sm:$0xff]  ;;  %v1122_v55 = vld [vmem:[%s937_s28 + $0x1a0] sm:$0xff] }
  0x29   : > { %v1012_v10 = vsel %vm431_vm11, %v367_v50, %v495_v63  ;;  %vm433_vm13 = vcmp.ge.f32.partialorder %v369_v2, 0.0  ;;  %v497_v11 = vmul.f32 0.2, %v369_v2  ;;  %v300_v12 = vmul.f32 %v930_v0, %v229_v57  ;;  %v1113_v50 = vld [vmem:[%s937_s28 + $0x188] sm:$0xff]  ;;  %1462 = vst [vmem:[#allocation3_spill] sm:$0xff] %v1122_v55  ;;  %v1128_v57 = vld [vmem:[%s937_s28 + $0x1b0] sm:$0xff] }
  0x2a   : > { %v1015_v13 = vsel %vm432_vm12, %v368_v53, %v496_v6  ;;  %vm434_vm14 = vcmp.ge.f32.partialorder %v370_v7, 0.0  ;;  %v498_v14 = vmul.f32 0.2, %v370_v7  ;;  %v301_v15 = vmul.f32 %v930_v0, %v230_v61  ;;  %v1119_v53 = vld [vmem:[%s937_s28 + $0x198] sm:$0xff]  ;;  %v1125_v56 = vld [vmem:[%s937_s28 + $0x1a8] sm:$0xff]  ;;  %1464 = vst [vmem:[#allocation5_spill] sm:$0xff] %v1128_v57 }
  0x2b   : > { %1461 = vst [vmem:[#allocation2_spill] sm:$0xff] %v1119_v53  ;;  %1463 = vst [vmem:[#allocation4_spill] sm:$0xff] %v1125_v56  ;;  %v1131_v59 = vld [vmem:[%s937_s28 + $0x1b8] sm:$0xff]  ;;  %v1134_v60 = vld [vmem:[%s937_s28 + $0x1c0] sm:$0xff]  ;;  %v561_v63 = vsel %vm433_vm13, %v369_v2, %v497_v11  ;;  %v371_v6 = vadd.f32 %v942_v1, %v300_v12  ;;  %v302_v53 = vmul.f32 %v930_v0, %v231_v3 }
  0x2c   : > { %1465 = vst [vmem:[#allocation6_spill] sm:$0xff] %v1131_v59  ;;  %v1137_v61 = vld [vmem:[%s937_s28 + $0x1c8] sm:$0xff]  ;;  %v303_v56 = vmul.f32 %v930_v0, %v232_v4  ;;  %v1144_v55 = vld [vmem:[%s937_s28 + $0x1d0] sm:$0xff]  ;;  %v1147_v57 = vld [vmem:[%s937_s28 + $0x1d8] sm:$0xff]  ;;  %v372_v2 = vadd.f32 %v942_v1, %v301_v15  ;;  %v304_v3 = vmul.f32 %v930_v0, %v233_v8  ;;  %v305_v4 = vmul.f32 %v930_v0, %v234_v9 }
  0x2d   : > { %1466 = vst [vmem:[#allocation7_spill] sm:$0xff] %v1137_v61  ;;  %v1150_v59 = vld [vmem:[%s937_s28 + $0x1e0] sm:$0xff]  ;;  %v562_v61 = vsel %vm434_vm14, %v370_v7, %v498_v14  ;;  %v1157_v11 = vld [vmem:[%s937_s28 + $0x1e8] sm:$0xff]  ;;  %v1160_v12 = vld [vmem:[%s937_s28 + $0x1f0] sm:$0xff]  ;;  %vm435_vm15 = vcmp.ge.f32.partialorder %v371_v6, 0.0  ;;  %v373_v14 = vadd.f32 %v942_v1, %v302_v53  ;;  %v306_v9 = vmul.f32 %v930_v0, %v1026_v16 }
  0x2e   : > { %1467 = vst [vmem:[#allocation8_spill] sm:$0xff] %v1150_v59  ;;  %v1163_v59 = vld [vmem:[%s937_s28 + $0x1f8] sm:$0xff]  ;;  %v499_v7 = vmul.f32 0.2, %v371_v6  ;;  %v374_v8 = vadd.f32 %v942_v1, %v303_v56  ;;  %vm436_vm0 = vcmp.ge.f32.partialorder %v372_v2, 0.0  ;;  %v307_v15 = vmul.f32 %v930_v0, %v1029_v17 }
  0x2f   : > { %614 = vst.msk [vmem:[%s1023_s6] sm:$0xff] %vm613_vm6, %v974_v34  ;;  %615 = vst.msk [vmem:[%s1023_s6 + $0x8] sm:$0xff] %vm613_vm6, %v977_v37  ;;  %v500_v34 = vmul.f32 0.2, %v372_v2  ;;  %v375_v37 = vadd.f32 %v942_v1, %v304_v3  ;;  %vm437_vm1 = vcmp.ge.f32.partialorder %v373_v14, 0.0  ;;  %v308_v53 = vmul.f32 %v930_v0, %v1032_v18 }
  0x30   : > { %616 = vst.msk [vmem:[%s1023_s6 + $0x10] sm:$0xff] %vm613_vm6, %v980_v40  ;;  %617 = vst.msk [vmem:[%s1023_s6 + $0x18] sm:$0xff] %vm613_vm6, %v984_v44  ;;  %v376_v40 = vadd.f32 %v942_v1, %v305_v4  ;;  %v563_v44 = vsel %vm435_vm15, %v371_v6, %v499_v7  ;;  %vm438_vm2 = vcmp.ge.f32.partialorder %v374_v8, 0.0  ;;  %v309_v16 = vmul.f32 %v930_v0, %v1035_v19 }
  0x31   : > { %618 = vst.msk [vmem:[%s1023_s6 + $0x20] sm:$0xff] %vm613_vm6, %v988_v48  ;;  %619 = vst.msk [vmem:[%s1023_s6 + $0x28] sm:$0xff] %vm613_vm6, %v991_v51  ;;  %v501_v48 = vmul.f32 0.2, %v373_v14  ;;  %v564_v51 = vsel %vm436_vm0, %v372_v2, %v500_v34  ;;  %vm439_vm3 = vcmp.ge.f32.partialorder %v375_v37, 0.0  ;;  %v378_v17 = vadd.f32 %v942_v1, %v307_v15 }
  0x32   : > { %620 = vst.msk [vmem:[%s1023_s6 + $0x30] sm:$0xff] %vm613_vm6, %v994_v54  ;;  %621 = vst.msk [vmem:[%s1023_s6 + $0x38] sm:$0xff] %vm613_vm6, %v998_v58  ;;  %v502_v54 = vmul.f32 0.2, %v374_v8  ;;  %v503_v58 = vmul.f32 0.2, %v375_v37  ;;  %v379_v18 = vadd.f32 %v942_v1, %v308_v53  ;;  %v311_v6 = vmul.f32 %v930_v0, %v1041_v21 }
  0x33   : > { %622 = vst.msk [vmem:[%s1023_s6 + $0x40] sm:$0xff] %vm613_vm6, %v1002_v62  ;;  %623 = vst.msk [vmem:[%s1023_s6 + $0x48] sm:$0xff] %vm613_vm6, %v1007_v5  ;;  %v565_v62 = vsel %vm437_vm1, %v373_v14, %v501_v48  ;;  %vm440_vm4 = vcmp.ge.f32.partialorder %v376_v40, 0.0  ;;  %v504_v5 = vmul.f32 0.2, %v376_v40  ;;  %v312_v2 = vmul.f32 %v930_v0, %v1044_v22 }
  0x34   : > { %624 = vst.msk [vmem:[%s1023_s6 + $0x50] sm:$0xff] %vm613_vm6, %v1012_v10  ;;  %625 = vst.msk [vmem:[%s1023_s6 + $0x58] sm:$0xff] %vm613_vm6, %v1015_v13  ;;  %v566_v10 = vsel %vm438_vm2, %v374_v8, %v502_v54  ;;  %v567_v13 = vsel %vm439_vm3, %v375_v37, %v503_v58  ;;  %v380_v19 = vadd.f32 %v942_v1, %v309_v16  ;;  %vm442_vm7 = vcmp.ge.f32.partialorder %v378_v17, 0.0 }
  0x35   : > { %626 = vst.msk [vmem:[%s1023_s6 + $0x60] sm:$0xff] %vm613_vm6, %v561_v63  ;;  %627 = vst.msk [vmem:[%s1023_s6 + $0x68] sm:$0xff] %vm613_vm6, %v562_v61  ;;  %v568_v56 = vsel %vm440_vm4, %v376_v40, %v504_v5  ;;  %v377_v61 = vadd.f32 %v942_v1, %v306_v9  ;;  %v310_v63 = vmul.f32 %v930_v0, %v1038_v20  ;;  %v506_v4 = vmul.f32 0.2, %v378_v17 }
  0x36   : > { %628 = vst.msk [vmem:[%s1023_s6 + $0x70] sm:$0xff] %vm613_vm6, %v563_v44  ;;  %629 = vst.msk [vmem:[%s1023_s6 + $0x78] sm:$0xff] %vm613_vm6, %v564_v51  ;;  %vm443_vm8 = vcmp.ge.f32.partialorder %v379_v18, 0.0  ;;  %v507_v7 = vmul.f32 0.2, %v379_v18  ;;  %vm444_vm9 = vcmp.ge.f32.partialorder %v380_v19, 0.0  ;;  %v382_v37 = vadd.f32 %v942_v1, %v311_v6 }
  0x37   : > { %630 = vst.msk [vmem:[%s1023_s6 + $0x80] sm:$0xff] %vm613_vm6, %v565_v62  ;;  %631 = vst.msk [vmem:[%s1023_s6 + $0x88] sm:$0xff] %vm613_vm6, %v566_v10  ;;  %vm441_vm5 = vcmp.ge.f32.partialorder %v377_v61, 0.0  ;;  %v505_v3 = vmul.f32 0.2, %v377_v61  ;;  %v381_v20 = vadd.f32 %v942_v1, %v310_v63  ;;  %v570_v21 = vsel %vm442_vm7, %v378_v17, %v506_v4 }
  0x38   : > { %632 = vst.msk [vmem:[%s1023_s6 + $0x90] sm:$0xff] %vm613_vm6, %v567_v13  ;;  %633 = vst.msk [vmem:[%s1023_s6 + $0x98] sm:$0xff] %vm613_vm6, %v568_v56  ;;  %v508_v8 = vmul.f32 0.2, %v380_v19  ;;  %v571_v22 = vsel %vm443_vm8, %v379_v18, %v507_v7  ;;  %v383_v44 = vadd.f32 %v942_v1, %v312_v2  ;;  %v313_v48 = vmul.f32 %v930_v0, %v1047_v23 }
  0x39   : > { %v569_v14 = vsel %vm441_vm5, %v377_v61, %v505_v3  ;;  %vm445_vm10 = vcmp.ge.f32.partialorder %v381_v20, 0.0  ;;  %v509_v34 = vmul.f32 0.2, %v381_v20  ;;  %635 = vst.msk [vmem:[%s1023_s6 + $0xa8] sm:$0xff] %vm613_vm6, %v570_v21  ;;  %636 = vst.msk [vmem:[%s1023_s6 + $0xb0] sm:$0xff] %vm613_vm6, %v571_v22  ;;  %v314_v51 = vmul.f32 %v930_v0, %v1050_v24 }
  0x3a   : > { %634 = vst.msk [vmem:[%s1023_s6 + $0xa0] sm:$0xff] %vm613_vm6, %v569_v14  ;;  %v572_v40 = vsel %vm444_vm9, %v380_v19, %v508_v8  ;;  %vm446_vm11 = vcmp.ge.f32.partialorder %v382_v37, 0.0  ;;  %v510_v58 = vmul.f32 0.2, %v382_v37  ;;  %v315_v62 = vmul.f32 %v930_v0, %v1053_v25 }
  0x3b   : > { %637 = vst.msk [vmem:[%s1023_s6 + $0xb8] sm:$0xff] %vm613_vm6, %v572_v40  ;;  %v573_v54 = vsel %vm445_vm10, %v381_v20, %v509_v34  ;;  %vm447_vm12 = vcmp.ge.f32.partialorder %v383_v44, 0.0  ;;  %v511_v5 = vmul.f32 0.2, %v383_v44  ;;  %v384_v9 = vadd.f32 %v942_v1, %v313_v48 }
  0x3c   : > { %638 = vst.msk [vmem:[%s1023_s6 + $0xc0] sm:$0xff] %vm613_vm6, %v573_v54  ;;  %v385_v23 = vadd.f32 %v942_v1, %v314_v51  ;;  %v574_v10 = vsel %vm446_vm11, %v382_v37, %v510_v58  ;;  %v386_v24 = vadd.f32 %v942_v1, %v315_v62  ;;  %v316_v13 = vmul.f32 %v930_v0, %v1056_v26 }
  0x3d   : > { %v317_v15 = vmul.f32 %v930_v0, %v1059_v27  ;;  %639 = vst.msk [vmem:[%s1023_s6 + $0xc8] sm:$0xff] %vm613_vm6, %v574_v10  ;;  %v575_v25 = vsel %vm447_vm12, %v383_v44, %v511_v5  ;;  %vm448_vm13 = vcmp.ge.f32.partialorder %v384_v9, 0.0  ;;  %v512_v53 = vmul.f32 0.2, %v384_v9 }
  0x3e   : > { %vm449_vm14 = vcmp.ge.f32.partialorder %v385_v23, 0.0  ;;  %640 = vst.msk [vmem:[%s1023_s6 + $0xd0] sm:$0xff] %vm613_vm6, %v575_v25  ;;  %v513_v56 = vmul.f32 0.2, %v385_v23  ;;  %vm450_vm15 = vcmp.ge.f32.partialorder %v386_v24, 0.0  ;;  %v387_v16 = vadd.f32 %v942_v1, %v316_v13 }
  0x3f   : > { %v514_v61 = vmul.f32 0.2, %v386_v24  ;;  %v576_v26 = vsel %vm448_vm13, %v384_v9, %v512_v53  ;;  %v388_v63 = vadd.f32 %v942_v1, %v317_v15  ;;  %v318_v27 = vmul.f32 %v930_v0, %v1062_v28 }
  0x40   : > { %v319_v17 = vmul.f32 %v930_v0, %v1065_v29  ;;  %641 = vst.msk [vmem:[%s1023_s6 + $0xd8] sm:$0xff] %vm613_vm6, %v576_v26  ;;  %v577_v18 = vsel %vm449_vm14, %v385_v23, %v513_v56  ;;  %vm451_vm0 = vcmp.ge.f32.partialorder %v387_v16, 0.0  ;;  %v515_v2 = vmul.f32 0.2, %v387_v16 }
  0x41   : > { %v578_v6 = vsel %vm450_vm15, %v386_v24, %v514_v61  ;;  %642 = vst.msk [vmem:[%s1023_s6 + $0xe0] sm:$0xff] %vm613_vm6, %v577_v18  ;;  %vm452_vm1 = vcmp.ge.f32.partialorder %v388_v63, 0.0  ;;  %v516_v3 = vmul.f32 0.2, %v388_v63  ;;  %v389_v19 = vadd.f32 %v942_v1, %v318_v27 }
  0x42   : > { %643 = vst.msk [vmem:[%s1023_s6 + $0xe8] sm:$0xff] %vm613_vm6, %v578_v6  ;;  %v390_v28 = vadd.f32 %v942_v1, %v319_v17  ;;  %v579_v20 = vsel %vm451_vm0, %v387_v16, %v515_v2  ;;  %v320_v29 = vmul.f32 %v930_v0, %v1068_v30  ;;  %v321_v4 = vmul.f32 %v930_v0, %v1071_v31 }
  0x43   : > { %v322_v7 = vmul.f32 %v930_v0, %v1074_v32  ;;  %644 = vst.msk [vmem:[%s1023_s6 + $0xf0] sm:$0xff] %vm613_vm6, %v579_v20  ;;  %v580_v14 = vsel %vm452_vm1, %v388_v63, %v516_v3  ;;  %vm453_vm2 = vcmp.ge.f32.partialorder %v389_v19, 0.0  ;;  %v517_v8 = vmul.f32 0.2, %v389_v19 }
  0x44   : > { %vm454_vm3 = vcmp.ge.f32.partialorder %v390_v28, 0.0  ;;  %645 = vst.msk [vmem:[%s1023_s6 + $0xf8] sm:$0xff] %vm613_vm6, %v580_v14  ;;  %v518_v21 = vmul.f32 0.2, %v390_v28  ;;  %v391_v22 = vadd.f32 %v942_v1, %v320_v29  ;;  %v392_v30 = vadd.f32 %v942_v1, %v321_v4 }
  0x45   : > { %v393_v31 = vadd.f32 %v942_v1, %v322_v7  ;;  %v581_v34 = vsel %vm453_vm2, %v389_v19, %v517_v8  ;;  %v323_v32 = vmul.f32 %v930_v0, %v1077_v33  ;;  %v324_v37 = vmul.f32 %v930_v0, %v1080_v35 }
  0x46   : > { %v325_v40 = vmul.f32 %v930_v0, %v1083_v36  ;;  %646 = vst.msk [vmem:[%s1023_s6 + $0x100] sm:$0xff] %vm613_vm6, %v581_v34  ;;  %v582_v44 = vsel %vm454_vm3, %v390_v28, %v518_v21  ;;  %vm455_vm4 = vcmp.ge.f32.partialorder %v391_v22, 0.0  ;;  %v519_v48 = vmul.f32 0.2, %v391_v22 }
  0x47   : > { %vm456_vm5 = vcmp.ge.f32.partialorder %v392_v30, 0.0  ;;  %647 = vst.msk [vmem:[%s1023_s6 + $0x108] sm:$0xff] %vm613_vm6, %v582_v44  ;;  %v520_v51 = vmul.f32 0.2, %v392_v30  ;;  %vm457_vm7 = vcmp.ge.f32.partialorder %v393_v31, 0.0  ;;  %v394_v54 = vadd.f32 %v942_v1, %v323_v32  ;;  %v1469_v32 = vld [vmem:[#allocation3_spill] sm:$0xff] }
  0x48   : > { %v521_v33 = vmul.f32 0.2, %v393_v31  ;;  %v583_v35 = vsel %vm455_vm4, %v391_v22, %v519_v48  ;;  %v395_v58 = vadd.f32 %v942_v1, %v324_v37  ;;  %v396_v36 = vadd.f32 %v942_v1, %v325_v40 }
  0x49   : > { %v326_v62 = vmul.f32 %v930_v0, %v1086_v38  ;;  %648 = vst.msk [vmem:[%s1023_s6 + $0x110] sm:$0xff] %vm613_vm6, %v583_v35  ;;  %v584_v5 = vsel %vm456_vm5, %v392_v30, %v520_v51  ;;  %vm458_vm8 = vcmp.ge.f32.partialorder %v394_v54, 0.0  ;;  %v522_v23 = vmul.f32 0.2, %v394_v54  ;;  %v1470_v35 = vld [vmem:[#allocation4_spill] sm:$0xff] }
  0x4a   : > { %v585_v9 = vsel %vm457_vm7, %v393_v31, %v521_v33  ;;  %649 = vst.msk [vmem:[%s1023_s6 + $0x118] sm:$0xff] %vm613_vm6, %v584_v5  ;;  %vm459_vm9 = vcmp.ge.f32.partialorder %v395_v58, 0.0  ;;  %v523_v10 = vmul.f32 0.2, %v395_v58  ;;  %vm460_vm10 = vcmp.ge.f32.partialorder %v396_v36, 0.0  ;;  %v1468_v31 = vld [vmem:[#allocation2_spill] sm:$0xff] }
  0x4b   : > { %650 = vst.msk [vmem:[%s1023_s6 + $0x120] sm:$0xff] %vm613_vm6, %v585_v9  ;;  %v524_v24 = vmul.f32 0.2, %v396_v36  ;;  %v586_v13 = vsel %vm458_vm8, %v394_v54, %v522_v23  ;;  %v397_v38 = vadd.f32 %v942_v1, %v326_v62  ;;  %v327_v15 = vmul.f32 %v930_v0, %v1089_v39 }
  0x4c   : > { %v328_v25 = vmul.f32 %v930_v0, %v1092_v41  ;;  %651 = vst.msk [vmem:[%s1023_s6 + $0x128] sm:$0xff] %vm613_vm6, %v586_v13  ;;  %v587_v53 = vsel %vm459_vm9, %v395_v58, %v523_v10  ;;  %v329_v61 = vmul.f32 %v930_v0, %v1095_v42  ;;  %v330_v16 = vmul.f32 %v930_v0, %v1098_v43 }
  0x4d   : > { %v588_v56 = vsel %vm460_vm10, %v396_v36, %v524_v24  ;;  %652 = vst.msk [vmem:[%s1023_s6 + $0x130] sm:$0xff] %vm613_vm6, %v587_v53  ;;  %vm461_vm11 = vcmp.ge.f32.partialorder %v397_v38, 0.0  ;;  %v525_v39 = vmul.f32 0.2, %v397_v38  ;;  %v398_v26 = vadd.f32 %v942_v1, %v327_v15  ;;  %v1471_v36 = vld [vmem:[#allocation5_spill] sm:$0xff] }
  0x4e   : > { %653 = vst.msk [vmem:[%s1023_s6 + $0x138] sm:$0xff] %vm613_vm6, %v588_v56  ;;  %v399_v41 = vadd.f32 %v942_v1, %v328_v25  ;;  %v400_v63 = vadd.f32 %v942_v1, %v329_v61  ;;  %v401_v27 = vadd.f32 %v942_v1, %v330_v16  ;;  %v331_v42 = vmul.f32 %v930_v0, %v1101_v45  ;;  %v1472_v56 = vld [vmem:[#allocation6_spill] sm:$0xff] }
  0x4f   : > { %v332_v43 = vmul.f32 %v930_v0, %v1104_v46  ;;  %v589_v17 = vsel %vm461_vm11, %v397_v38, %v525_v39  ;;  %vm462_vm12 = vcmp.ge.f32.partialorder %v398_v26, 0.0  ;;  %v526_v18 = vmul.f32 0.2, %v398_v26 }
  0x50   : > { %vm463_vm13 = vcmp.ge.f32.partialorder %v399_v41, 0.0  ;;  %654 = vst.msk [vmem:[%s1023_s6 + $0x140] sm:$0xff] %vm613_vm6, %v589_v17  ;;  %v527_v6 = vmul.f32 0.2, %v399_v41  ;;  %vm464_vm14 = vcmp.ge.f32.partialorder %v400_v63, 0.0  ;;  %vm465_vm15 = vcmp.ge.f32.partialorder %v401_v27, 0.0 }
  0x51   : > { %v528_v2 = vmul.f32 0.2, %v400_v63  ;;  %v590_v3 = vsel %vm462_vm12, %v398_v26, %v526_v18  ;;  %v529_v19 = vmul.f32 0.2, %v401_v27  ;;  %v402_v45 = vadd.f32 %v942_v1, %v331_v42  ;;  %v1473_v42 = vld [vmem:[#allocation7_spill] sm:$0xff] }
  0x52   : > { %v403_v28 = vadd.f32 %v942_v1, %v332_v43  ;;  %655 = vst.msk [vmem:[%s1023_s6 + $0x148] sm:$0xff] %vm613_vm6, %v590_v3  ;;  %v591_v46 = vsel %vm463_vm13, %v399_v41, %v527_v6  ;;  %v333_v29 = vmul.f32 %v930_v0, %v1107_v47  ;;  %v334_v4 = vmul.f32 %v930_v0, %v1110_v49  ;;  %v1474_v6 = vld [vmem:[#allocation8_spill] sm:$0xff] }
  0x53   : > { %v592_v20 = vsel %vm464_vm14, %v400_v63, %v528_v2  ;;  %656 = vst.msk [vmem:[%s1023_s6 + $0x150] sm:$0xff] %vm613_vm6, %v591_v46  ;;  %v593_v7 = vsel %vm465_vm15, %v401_v27, %v529_v19  ;;  %vm466_vm0 = vcmp.ge.f32.partialorder %v402_v45, 0.0  ;;  %v530_v14 = vmul.f32 0.2, %v402_v45 }
  0x54   : > { %657 = vst.msk [vmem:[%s1023_s6 + $0x158] sm:$0xff] %vm613_vm6, %v592_v20  ;;  %vm467_vm1 = vcmp.ge.f32.partialorder %v403_v28, 0.0  ;;  %658 = vst.msk [vmem:[%s1023_s6 + $0x160] sm:$0xff] %vm613_vm6, %v593_v7  ;;  %v531_v8 = vmul.f32 0.2, %v403_v28  ;;  %v404_v21 = vadd.f32 %v942_v1, %v333_v29  ;;  %v405_v47 = vadd.f32 %v942_v1, %v334_v4 }
  0x55   : > { %v335_v49 = vmul.f32 %v930_v0, %v1113_v50  ;;  %v594_v22 = vsel %vm466_vm0, %v402_v45, %v530_v14  ;;  %v336_v30 = vmul.f32 %v930_v0, %v1116_v52  ;;  %v337_v34 = vmul.f32 %v930_v0, %v1468_v31 }
  0x56   : > { %v338_v37 = vmul.f32 %v930_v0, %v1469_v32  ;;  %659 = vst.msk [vmem:[%s1023_s6 + $0x168] sm:$0xff] %vm613_vm6, %v594_v22  ;;  %v595_v40 = vsel %vm467_vm1, %v403_v28, %v531_v8  ;;  %vm468_vm2 = vcmp.ge.f32.partialorder %v404_v21, 0.0  ;;  %v532_v44 = vmul.f32 0.2, %v404_v21 }
  0x57   : > { %vm469_vm3 = vcmp.ge.f32.partialorder %v405_v47, 0.0  ;;  %660 = vst.msk [vmem:[%s1023_s6 + $0x170] sm:$0xff] %vm613_vm6, %v595_v40  ;;  %v533_v50 = vmul.f32 0.2, %v405_v47  ;;  %v406_v48 = vadd.f32 %v942_v1, %v335_v49  ;;  %v407_v52 = vadd.f32 %v942_v1, %v336_v30 }
  0x58   : > { %v408_v51 = vadd.f32 %v942_v1, %v337_v34  ;;  %v596_v33 = vsel %vm468_vm2, %v404_v21, %v532_v44  ;;  %v409_v54 = vadd.f32 %v942_v1, %v338_v37  ;;  %v339_v58 = vmul.f32 %v930_v0, %v1470_v35 }
  0x59   : > { %v340_v62 = vmul.f32 %v930_v0, %v1471_v36  ;;  %661 = vst.msk [vmem:[%s1023_s6 + $0x178] sm:$0xff] %vm613_vm6, %v596_v33  ;;  %v597_v5 = vsel %vm469_vm3, %v405_v47, %v533_v50  ;;  %vm470_vm4 = vcmp.ge.f32.partialorder %v406_v48, 0.0  ;;  %v534_v9 = vmul.f32 0.2, %v406_v48 }
  0x5a   : > { %vm471_vm5 = vcmp.ge.f32.partialorder %v407_v52, 0.0  ;;  %662 = vst.msk [vmem:[%s1023_s6 + $0x180] sm:$0xff] %vm613_vm6, %v597_v5  ;;  %v535_v23 = vmul.f32 0.2, %v407_v52  ;;  %vm472_vm7 = vcmp.ge.f32.partialorder %v408_v51, 0.0  ;;  %vm473_vm8 = vcmp.ge.f32.partialorder %v409_v54, 0.0 }
  0x5b   : > { %v536_v10 = vmul.f32 0.2, %v408_v51  ;;  %v598_v24 = vsel %vm470_vm4, %v406_v48, %v534_v9  ;;  %v537_v13 = vmul.f32 0.2, %v409_v54  ;;  %v410_v38 = vadd.f32 %v942_v1, %v339_v58 }
  0x5c   : > { %v411_v15 = vadd.f32 %v942_v1, %v340_v62  ;;  %663 = vst.msk [vmem:[%s1023_s6 + $0x188] sm:$0xff] %vm613_vm6, %v598_v24  ;;  %v599_v25 = vsel %vm471_vm5, %v407_v52, %v535_v23  ;;  %v341_v61 = vmul.f32 %v930_v0, %v1472_v56  ;;  %v342_v16 = vmul.f32 %v930_v0, %v1134_v60 }
  0x5d   : > { %v600_v53 = vsel %vm472_vm7, %v408_v51, %v536_v10  ;;  %664 = vst.msk [vmem:[%s1023_s6 + $0x190] sm:$0xff] %vm613_vm6, %v599_v25  ;;  %v601_v39 = vsel %vm473_vm8, %v409_v54, %v537_v13  ;;  %vm474_vm9 = vcmp.ge.f32.partialorder %v410_v38, 0.0  ;;  %v538_v26 = vmul.f32 0.2, %v410_v38 }
  0x5e   : > { %665 = vst.msk [vmem:[%s1023_s6 + $0x198] sm:$0xff] %vm613_vm6, %v600_v53  ;;  %vm475_vm10 = vcmp.ge.f32.partialorder %v411_v15, 0.0  ;;  %666 = vst.msk [vmem:[%s1023_s6 + $0x1a0] sm:$0xff] %vm613_vm6, %v601_v39  ;;  %v539_v41 = vmul.f32 0.2, %v411_v15  ;;  %v412_v63 = vadd.f32 %v942_v1, %v341_v61  ;;  %v413_v27 = vadd.f32 %v942_v1, %v342_v16 }
  0x5f   : > { %v343_v60 = vmul.f32 %v930_v0, %v1473_v42  ;;  %v602_v43 = vsel %vm474_vm9, %v410_v38, %v538_v26  ;;  %v344_v17 = vmul.f32 %v930_v0, %v1144_v55  ;;  %v345_v18 = vmul.f32 %v930_v0, %v1147_v57 }
  0x60   : > { %v346_v2 = vmul.f32 %v930_v0, %v1474_v6  ;;  %667 = vst.msk [vmem:[%s1023_s6 + $0x1a8] sm:$0xff] %vm613_vm6, %v602_v43  ;;  %v603_v3 = vsel %vm475_vm10, %v411_v15, %v539_v41  ;;  %vm476_vm11 = vcmp.ge.f32.partialorder %v412_v63, 0.0  ;;  %v540_v19 = vmul.f32 0.2, %v412_v63 }
  0x61   : > { %vm477_vm12 = vcmp.ge.f32.partialorder %v413_v27, 0.0  ;;  %668 = vst.msk [vmem:[%s1023_s6 + $0x1b0] sm:$0xff] %vm613_vm6, %v603_v3  ;;  %v541_v45 = vmul.f32 0.2, %v413_v27  ;;  %v414_v28 = vadd.f32 %v942_v1, %v343_v60  ;;  %v415_v55 = vadd.f32 %v942_v1, %v344_v17 }
  0x62   : > { %v416_v57 = vadd.f32 %v942_v1, %v345_v18  ;;  %v604_v46 = vsel %vm476_vm11, %v412_v63, %v540_v19  ;;  %v417_v20 = vadd.f32 %v942_v1, %v346_v2  ;;  %v347_v29 = vmul.f32 %v930_v0, %v1157_v11 }
  0x63   : > { %v348_v4 = vmul.f32 %v930_v0, %v1160_v12  ;;  %669 = vst.msk [vmem:[%s1023_s6 + $0x1b8] sm:$0xff] %vm613_vm6, %v604_v46  ;;  %v605_v7 = vsel %vm477_vm12, %v413_v27, %v541_v45  ;;  %vm478_vm13 = vcmp.ge.f32.partialorder %v414_v28, 0.0  ;;  %v542_v14 = vmul.f32 0.2, %v414_v28 }
  0x64   : > { %vm479_vm14 = vcmp.ge.f32.partialorder %v415_v55, 0.0  ;;  %670 = vst.msk [vmem:[%s1023_s6 + $0x1c0] sm:$0xff] %vm613_vm6, %v605_v7  ;;  %v543_v8 = vmul.f32 0.2, %v415_v55  ;;  %vm480_vm15 = vcmp.ge.f32.partialorder %v416_v57, 0.0  ;;  %vm481_vm0 = vcmp.ge.f32.partialorder %v417_v20, 0.0 }
  0x65   : > { %v544_v21 = vmul.f32 0.2, %v416_v57  ;;  %v606_v11 = vsel %vm478_vm13, %v414_v28, %v542_v14  ;;  %v545_v47 = vmul.f32 0.2, %v417_v20  ;;  %v418_v49 = vadd.f32 %v942_v1, %v347_v29 }
  0x66   : > { %v419_v12 = vadd.f32 %v942_v1, %v348_v4  ;;  %671 = vst.msk [vmem:[%s1023_s6 + $0x1c8] sm:$0xff] %vm613_vm6, %v606_v11  ;;  %v607_v22 = vsel %vm479_vm14, %v415_v55, %v543_v8  ;;  %v349_v31 = vmul.f32 %v930_v0, %v1163_v59 }
  0x67   : > { %v608_v30 = vsel %vm480_vm15, %v416_v57, %v544_v21  ;;  %672 = vst.msk [vmem:[%s1023_s6 + $0x1d0] sm:$0xff] %vm613_vm6, %v607_v22  ;;  %v609_v34 = vsel %vm481_vm0, %v417_v20, %v545_v47  ;;  %vm482_vm1 = vcmp.ge.f32.partialorder %v418_v49, 0.0  ;;  %v546_v32 = vmul.f32 0.2, %v418_v49 }
  0x68   : > { %673 = vst.msk [vmem:[%s1023_s6 + $0x1d8] sm:$0xff] %vm613_vm6, %v608_v30  ;;  %vm483_vm2 = vcmp.ge.f32.partialorder %v419_v12, 0.0  ;;  %674 = vst.msk [vmem:[%s1023_s6 + $0x1e0] sm:$0xff] %vm613_vm6, %v609_v34  ;;  %v547_v37 = vmul.f32 0.2, %v419_v12  ;;  %v420_v40 = vadd.f32 %v942_v1, %v349_v31 }
  0x69   : > { %v610_v44 = vsel %vm482_vm1, %v418_v49, %v546_v32 }
  0x6a   : > { %675 = vst.msk [vmem:[%s1023_s6 + $0x1e8] sm:$0xff] %vm613_vm6, %v610_v44  ;;  %v611_v50 = vsel %vm483_vm2, %v419_v12, %v547_v37  ;;  %vm484_vm3 = vcmp.ge.f32.partialorder %v420_v40, 0.0  ;;  %v548_v0 = vmul.f32 0.2, %v420_v40 }
  0x6b   : > { %676 = vst.msk [vmem:[%s1023_s6 + $0x1f0] sm:$0xff] %vm613_vm6, %v611_v50 }
  0x6c   : > { %v612_v59 = vsel %vm484_vm3, %v420_v40, %v548_v0 }
  0x6d   : > { %677 = vst.msk [vmem:[%s1023_s6 + $0x1f8] sm:$0xff] %vm613_vm6, %v612_v59 }
  0x6e PF: > { %s13_s16 = sadd.s32 1, %s872_s16   ;;  %s1475_s12 = smov %s864_s14 }
  0x6f   : > { %p10_p7 = scmp.ge.s32.totalorder %s13_s16, 6   ;;  %s1476_s13 = smov %s868_s15 }
  0x70   : > { %s1477_s14 = smov %s1480_s17  ;;  %s1478_s15 = smov %s1484_s18 }
  0x71   :  { %12 = sbr.rel (!%p10_p7) target bundleno = 3 (0x3), region = 62 }

// kernel: block_forward.2
= control target key start
LH: loop header
LB: loop body
LE: loop exit
PB: predicated region body
PF: predicated region fallthrough
CT: control target
= control target key end

     0   :  { %s2447_s12 = smov 0   ;;  %s2449_s13 = smov 0   ;;  %s3142_s0 = inlined_call_operand.vmem [shape: bf16[2,17,17,16], index: 0, kind: input, shape index: {}]   ;;  %s3143_s1 = inlined_call_operand.vmem [shape: bf16[2,2,16,8], index: 1, kind: input, shape index: {}]   ;;  %s3144_s2 = inlined_call_operand.vmem [shape: f32[2,16,2,16,16], index: 2, kind: output, shape index: {0}]   ;;  %s3145_s3 = inlined_call_operand.vmem [shape: f32[2,2,2,8], index: 3, kind: output, shape index: {1}]  }
   0x1   :  { %s2451_s14 = smov 0   ;;  %s2453_s15 = smov 0  }
   0x2   :  { %s2455_s16 = smov 0  }
   0x3 LB: > { %s23_s17 = sadd.s32 1, %s2416_s14  ;;  %s26_s18 = sadd.s32 1, %s2420_s15  ;;  %s2424_s16 = sphi %s2455_s16, %s14_s16   ;;  %s2420_s15 = sphi %s2453_s15, %s3151_s15   ;;  %s2416_s14 = sphi %s2451_s14, %s3150_s14   ;;  %s2412_s13 = sphi %s2449_s13, %s3149_s13   ;;  %s2408_s12 = sphi %s2447_s12, %s3148_s12  }
   0x4   : > { %p24_p0 = scmp.ge.s32.totalorder %s23_s17, 2  ;;  %p2054_p1 = scmp.ge.s32.totalorder %s2424_s16, 1 }
   0x5   : > { %p156_p2 = scmp.lt.s32.totalorder %s2424_s16, 5 }
   0x6   : > { %s3153_s17 = smov (%p24_p0, %s23_s17), 0  ;;  %s3155_s18 = smov (!%p24_p0, %s26_s18), %s2420_s15 }
   0x7   : > { %p157_p3 = pnand %p2054_p1, %p156_p2  ;;  %p28_p4 = scmp.ge.s32.totalorder %s3155_s18, 2 }
   0x8   : > { %v2366_v0 = vld [vmem:[%s3143_s1] sm:$0xff] (!%p157_p3)   ;;  %p193_p5 = scmp.lt.s32.totalorder (!%p157_p3), %s2412_s13, 1  ;;  %v2369_v1 = vld [vmem:[%s3143_s1 + $0x8] sm:$0xff] (!%p157_p3)   ;;  %s2215_s23 = smul.u32 (!%p157_p3), 96, %s2408_s12  ;;  %v2492_v2 = vld [vmem:[%s3143_s1 + $0x18] sm:$0xff] (!%p157_p3)   ;;  %vm286_vm0 = vcmask (!%p157_p3), 130048  }
   0x9   : > { %s3157_s18 = smov (%p28_p4, %s3155_s18), 0  ;;  %160 = sbr.rel (%p157_p3) target bundleno = 432 (0x1b0), region = 28 }
   0xa   : > { %2252 = vmatprep.subr.bf16.mxu0 (!%p157_p3), %v2366_v0  ;;  %2270 = vmatprep.subr.bf16.mxu1 (!%p157_p3), %v2369_v1  ;;  %v2377_v3 = vld [vmem:[%s3143_s1 + $0x10] sm:$0xff] (!%p157_p3)   ;;  %vm541_vm1 = vsmask.f32 (!%p157_p3), 3328  ;;  %vm542_vm2 = vsmask.f32 (!%p157_p3), 7440  ;;  %s2056_s6 = sshll.u32 (!%p157_p3), %s2408_s12, 3 }
   0xb   : > { %2253 = vmatpush3.bf16.msra.mxu0 (!%p157_p3), %v2366_v0  ;;  %2271 = vmatpush3.bf16.msra.mxu1 (!%p157_p3), %v2369_v1  ;;  %vm2519_vm3 = vmor (!%p157_p3), %vm541_vm1, %vm542_vm2  ;;  %p201_p6 = scmp.lt.s32.totalorder (!%p157_p3), %s2056_s6, 15  ;;  %vm408_vm4 = vcmask (!%p157_p3), 64512   ;;  %s2426_s21 = smov (!%p157_p3), 8   ;;  %vm1904_vm5 = vcmask (!%p157_p3), 57344   ;;  %vm1046_vm6 = vcmask (!%p157_p3), 130112  }
   0xc   : > { %2306 = vmatprep.subr.bf16.mxu1 (!%p157_p3), %v2492_v2  ;;  %2288 = vmatprep.subr.bf16.mxu0 (!%p157_p3), %v2377_v3  ;;  %p211_p7 = scmp.lt.s32.totalorder (!%p157_p3), %s2408_s12, 1 }
  0x10   : > { %s3159_s13 = smov (!%p193_p5, %s2412_s13), 1  ;;  %s3161_s6 = smov (!%p201_p6, %s2056_s6), 15 }
  0x11   : > { %s2324_s24 = smul.u32 204, %s3159_s13  ;;  %s2057_s7 = sshll.u32 %s3161_s6, 2 }
  0x12   : > { %s2058_s8 = sshll.u32 %s3159_s13, 6  ;;  %s3163_s12 = smov (!%p211_p7, %s2408_s12), 1 }
  0x13   : > { %s197_s4 = scalar_lea.vmem %s3142_s0, %s2324_s24  ;;  %s205_s9 = sadd.s32 %s2058_s8, %s2057_s7 }
  0x14   : > { %s2501_s5 = scalar_lea.vmem %s197_s4, %s2215_s23  ;;  %s2059_s10 = sshll.u32 %s205_s9, 3 }
  0x15   : > { %v2367_v4 = vld [vmem:[%s2501_s5] sm:$0xff]   ;;  %v2368_v5 = vld [vmem:[%s2501_s5 + $0xc] sm:$0xff]   ;;  %v2370_v6 = vld [vmem:[%s2501_s5 + $0x18] sm:$0xff]   ;;  %s2675_s20 = scalar_lea.vmem %s3144_s2, %s2059_s10  ;;  %s2060_s22 = sshll.u32 %s3159_s13, 1 }
  0x16   : > { %2254 = vmatprep.mubr.msk.bf16.mxu0 %vm286_vm0, %v2367_v4  ;;  %v517_v7 = vld [vmem:[%s2501_s5] sm:$0xf]  ;;  %v518_v8 = vld [vmem:[%s2501_s5 + $0x4] sm:$0xf]  ;;  %v519_v9 = vld [vmem:[%s2501_s5 + $0x8] sm:$0x1]  ;;  %s214_s23 = sadd.s32 %s2060_s22, %s3163_s12 }
  0x17   : > { %2255 = vmatmul.mubr.msk.bf16.vlgmr.msra.gmra.mrb[0].mxu0 %vm286_vm0, %v2368_v5  ;;  %v2371_v10 = vld [vmem:[%s2501_s5 + $0x24] sm:$0xff]   ;;  %v545_v11 = vshrl.u32 %v517_v7, 16  ;;  %v548_v12 = vshll.u32 %v517_v7, 16  ;;  %v554_v13 = vshll.u32 %v518_v8, 16  ;;  %v558_v14 = vshrl.u32 %v518_v8, 16  ;;  %v2373_v32 = vld [vmem:[%s2501_s5 + $0x30] sm:$0xff]  }
  0x18   : > { %2258 = vmatprep.mubr.msk.bf16.mxu0 %vm286_vm0, %v2370_v6  ;;  %2289 = vmatpush3.bf16.msra.mxu0 %v2377_v3  ;;  %v520_v15 = vld [vmem:[%s2501_s5 + $0xc] sm:$0xf]  ;;  %v564_v16 = vshll.u32 %v519_v9, 16  ;;  %v521_v17 = vld [vmem:[%s2501_s5 + $0x10] sm:$0xf]  ;;  %v2374_v50 = vld [vmem:[%s2501_s5 + $0x3c] sm:$0xff]  }
  0x19   : > { %v522_v18 = vld [vmem:[%s2501_s5 + $0x14] sm:$0x1]  ;;  %v569_v19 = vshrl.u32 %v520_v15, 16  ;;  %v547_v20 = vrot.slane %v545_v11, 4  ;;  %v550_v21 = vrot.slane %v548_v12, 5  ;;  %v556_v22 = vrot.slane %v554_v13, 5 }
  0x1a   : > { %v560_v23 = vrot.slane %v558_v14, 4  ;;  %v566_v24 = vrot.slane %v564_v16, 5  ;;  %v572_v26 = vshll.u32 %v520_v15, 16  ;;  %v578_v27 = vshll.u32 %v521_v17, 16  ;;  %v523_v36 = vld [vmem:[%s2501_s5 + $0x18] sm:$0xf] }
  0x1b   : > { %v571_v25 = vrot.slane %v569_v19, 4  ;;  %v551_v28 = vor.u32 %v550_v21, %v547_v20  ;;  %v582_v30 = vshrl.u32 %v521_v17, 16  ;;  %v588_v31 = vshll.u32 %v522_v18, 16  ;;  %v524_v41 = vld [vmem:[%s2501_s5 + $0x1c] sm:$0xf]  ;;  %v2375_v59 = vld [vmem:[%s2501_s5 + $0x48] sm:$0xff]  }
  0x1c   : > { %v561_v29 = vor.u32 %v560_v23, %v556_v22  ;;  %v574_v34 = vrot.slane %v572_v26, 5  ;;  %v580_v35 = vrot.slane %v578_v27, 5  ;;  %v525_v43 = vld [vmem:[%s2501_s5 + $0x20] sm:$0x1]  ;;  %v593_v44 = vshrl.u32 %v523_v36, 16  ;;  %s2061_s24 = sshll.u32 %s214_s23, 1 }
  0x1d   : > { %v552_v37 = vrot.slane %v551_v28, 4  ;;  %v584_v39 = vrot.slane %v582_v30, 4  ;;  %v590_v40 = vrot.slane %v588_v31, 5  ;;  %v596_v45 = vshll.u32 %v523_v36, 16  ;;  %v526_v52 = vld [vmem:[%s2501_s5 + $0x24] sm:$0xf]  ;;  %s216_s26 = scalar_lea.vmem %s3145_s3, %s2061_s24 }
  0x1e   : > { %v562_v38 = vrot.slane %v561_v29, 4  ;;  %v575_v42 = vor.u32 %v574_v34, %v571_v25  ;;  %v602_v46 = vshll.u32 %v524_v41, 16  ;;  %v606_v51 = vshrl.u32 %v524_v41, 16  ;;  %v527_v53 = vld [vmem:[%s2501_s5 + $0x28] sm:$0xf]  ;;  %v2376_v36 = vld [vmem:[%s2501_s5 + $0x54] sm:$0xff]  }
  0x1f   : > { %2259 = vmatmul.mubr.msk.bf16.gmra.mrb[4].mxu0 %vm286_vm0, %v2371_v10  ;;  %v557_v47 = vsel %vm2519_vm3, %v552_v37, %v556_v22  ;;  %v585_v49 = vor.u32 %v584_v39, %v580_v35  ;;  %v595_v56 = vrot.slane %v593_v44, 4  ;;  %v598_v57 = vrot.slane %v596_v45, 5  ;;  %v528_v58 = vld [vmem:[%s2501_s5 + $0x2c] sm:$0x1]  ;;  %v529_v9 = vld [vmem:[%s2501_s5 + $0x30] sm:$0xf] }
  0x20   : > { %2262 = vmatprep.mubr.msk.bf16.mxu0 %vm286_vm0, %v2373_v32  ;;  %v567_v48 = vsel %vm2519_vm3, %v562_v38, %v566_v24  ;;  %v576_v55 = vrot.slane %v575_v42, 4  ;;  %v604_v61 = vrot.slane %v602_v46, 5  ;;  %v608_v62 = vrot.slane %v606_v51, 4  ;;  %v530_v14 = vld [vmem:[%s2501_s5 + $0x34] sm:$0xf]  ;;  %v2378_v44 = vld [vmem:[%s2501_s5 + $0xc] sm:$0xff]  }
  0x21   : > { %v2084_v54 = vcombine.low %v557_v47, %v567_v48  ;;  %v586_v60 = vrot.slane %v585_v49, 4  ;;  %v612_v63 = vshll.u32 %v525_v43, 16  ;;  %v599_v1 = vor.u32 %v598_v57, %v595_v56  ;;  %v531_v21 = vld [vmem:[%s2501_s5 + $0x38] sm:$0x1]  ;;  %v532_v24 = vld [vmem:[%s2501_s5 + $0x3c] sm:$0xf] }
  0x22   : > { %v581_v0 = vsel %vm2519_vm3, %v576_v55, %v580_v35  ;;  %v617_v3 = vshrl.u32 %v526_v52, 16  ;;  %v620_v4 = vshll.u32 %v526_v52, 16  ;;  %v609_v6 = vor.u32 %v608_v62, %v604_v61  ;;  %v533_v29 = vld [vmem:[%s2501_s5 + $0x40] sm:$0xf]  ;;  %v534_v41 = vld [vmem:[%s2501_s5 + $0x44] sm:$0x1] }
  0x23   : > { %2272 = vmatprep.mubr.msk.bf16.mxu1 %vm286_vm0, %v2084_v54  ;;  %v591_v5 = vsel %vm2519_vm3, %v586_v60, %v590_v40  ;;  %v614_v7 = vrot.slane %v612_v63, 5  ;;  %v626_v8 = vshll.u32 %v527_v53, 16  ;;  %v600_v11 = vrot.slane %v599_v1, 4  ;;  %v535_v49 = vld [vmem:[%s2501_s5 + $0x48] sm:$0xf] }
  0x24   : > { %v2085_v10 = vcombine.low %v581_v0, %v591_v5  ;;  %v619_v12 = vrot.slane %v617_v3, 4  ;;  %v622_v13 = vrot.slane %v620_v4, 5  ;;  %v610_v15 = vrot.slane %v609_v6, 4  ;;  %v537_v63 = vld [vmem:[%s2501_s5 + $0x50] sm:$0x1] }
  0x25   : > { %v628_v16 = vrot.slane %v626_v8, 5  ;;  %v630_v17 = vshrl.u32 %v527_v53, 16  ;;  %v636_v18 = vshll.u32 %v528_v58, 16  ;;  %v605_v19 = vsel %vm2519_vm3, %v600_v11, %v604_v61  ;;  %v536_v58 = vld [vmem:[%s2501_s5 + $0x4c] sm:$0xf] }
  0x26   : > { %2273 = vmatmul.mubr.msk.bf16.vlgmr.msra.gmra.mrb[0].mxu1 %vm286_vm0, %v2085_v10  ;;  %v623_v20 = vor.u32 %v622_v13, %v619_v12  ;;  %v641_v22 = vshrl.u32 %v529_v9, 16  ;;  %v644_v23 = vshll.u32 %v529_v9, 16  ;;  %v615_v25 = vsel %vm2519_vm3, %v610_v15, %v614_v7  ;;  %v538_v0 = vld [vmem:[%s2501_s5 + $0x54] sm:$0xf]  ;;  %v539_v6 = vld [vmem:[%s2501_s5 + $0x58] sm:$0xf] }
  0x27   : > { %2263 = vmatmul.mubr.msk.bf16.gmra.mrb[8].mxu0 %vm286_vm0, %v2374_v50  ;;  %2307 = vmatpush3.bf16.msra.mxu1 %v2492_v2  ;;  %v632_v26 = vrot.slane %v630_v17, 4  ;;  %v638_v27 = vrot.slane %v636_v18, 5  ;;  %v650_v28 = vshll.u32 %v530_v14, 16  ;;  %v2086_v30 = vcombine.low %v605_v19, %v615_v25  ;;  %v2379_v15 = vld [vmem:[%s2501_s5 + $0x18] sm:$0xff]  }
  0x28   : > { %2266 = vmatprep.mubr.msk.bf16.mxu0 %vm286_vm0, %v2375_v59  ;;  %v624_v31 = vrot.slane %v623_v20, 4  ;;  %v643_v32 = vrot.slane %v641_v22, 4  ;;  %v646_v34 = vrot.slane %v644_v23, 5  ;;  %v654_v38 = vshrl.u32 %v530_v14, 16  ;;  %v2380_v20 = vld [vmem:[%s2501_s5 + $0x24] sm:$0xff]  }
  0x29   : > { %v633_v35 = vor.u32 %v632_v26, %v628_v16  ;;  %v652_v37 = vrot.slane %v650_v28, 5  ;;  %v660_v39 = vshll.u32 %v531_v21, 16  ;;  %2276 = vmatprep.mubr.msk.bf16.mxu1 %vm286_vm0, %v2086_v30  ;;  %v665_v42 = vshrl.u32 %v532_v24, 16  ;;  %v2154_v30 = vld [vmem:[%s2501_s5 + $0xc] sm:$0xf] }
  0x2a   : > { %v629_v2 = vsel %vm2519_vm3, %v624_v31, %v628_v16  ;;  %v647_v40 = vor.u32 %v646_v34, %v643_v32  ;;  %v668_v43 = vshll.u32 %v532_v24, 16  ;;  %v656_v46 = vrot.slane %v654_v38, 4  ;;  %v540_v24 = vld [vmem:[%s2501_s5 + $0x5c] sm:$0x1] }
  0x2b   : > { %v634_v45 = vrot.slane %v633_v35, 4  ;;  %v662_v47 = vrot.slane %v660_v39, 5  ;;  %v674_v48 = vshll.u32 %v533_v29, 16  ;;  %v667_v51 = vrot.slane %v665_v42, 4 }
  0x2c   : > { %v648_v50 = vrot.slane %v647_v40, 4  ;;  %v670_v52 = vrot.slane %v668_v43, 5  ;;  %v678_v53 = vshrl.u32 %v533_v29, 16  ;;  %v657_v55 = vor.u32 %v656_v46, %v652_v37  ;;  %v2156_v40 = vld [vmem:[%s2501_s5 + $0x14] sm:$0x1] }
  0x2d   : > { %v639_v54 = vsel %vm2519_vm3, %v634_v45, %v638_v27  ;;  %v676_v56 = vrot.slane %v674_v48, 5  ;;  %v684_v57 = vshll.u32 %v534_v41, 16  ;;  %v689_v4 = vshrl.u32 %v535_v49, 16  ;;  %v2157_v41 = vld [vmem:[%s2501_s5 + $0x18] sm:$0xf] }
  0x2e   : > { %v2087_v59 = vcombine.low %v629_v2, %v639_v54  ;;  %v653_v60 = vsel %vm2519_vm3, %v648_v50, %v652_v37  ;;  %v671_v61 = vor.u32 %v670_v52, %v667_v51  ;;  %v680_v62 = vrot.slane %v678_v53, 4  ;;  %v2158_v46 = vld [vmem:[%s2501_s5 + $0x1c] sm:$0xf]  ;;  %v2381_v52 = vld [vmem:[%s2501_s5 + $0x30] sm:$0xff]  }
  0x2f   : > { %2267 = vmatmul.mubr.msk.bf16.gmra.mrb[12].mxu0 %vm286_vm0, %v2376_v36  ;;  %v658_v1 = vrot.slane %v657_v55, 4  ;;  %v686_v3 = vrot.slane %v684_v57, 5  ;;  %v692_v5 = vshll.u32 %v535_v49, 16  ;;  %v698_v9 = vshll.u32 %v536_v58, 16  ;;  %v2155_v36 = vld [vmem:[%s2501_s5 + $0x10] sm:$0xf] }
  0x30   : > { %2290 = vmatprep.mubr.msk.bf16.mxu0 %vm286_vm0, %v2378_v44  ;;  %2277 = vmatmul.mubr.msk.bf16.gmra.mrb[4].mxu1 %vm286_vm0, %v2087_v59  ;;  %v672_v7 = vrot.slane %v671_v61, 4  ;;  %v681_v8 = vor.u32 %v680_v62, %v676_v56  ;;  %v702_v10 = vshrl.u32 %v536_v58, 16  ;;  %v691_v12 = vrot.slane %v689_v4, 4  ;;  %v2159_v4 = vld [vmem:[%s2501_s5 + $0x20] sm:$0x1] }
  0x31   : > { %v663_v11 = vsel %vm2519_vm3, %v658_v1, %v662_v47  ;;  %v694_v13 = vrot.slane %v692_v5, 5  ;;  %v708_v14 = vshll.u32 %v537_v63, 16  ;;  %v700_v19 = vrot.slane %v698_v9, 5 }
  0x32   : > { %v2088_v16 = vcombine.low %v653_v60, %v663_v11  ;;  %v677_v17 = vsel %vm2519_vm3, %v672_v7, %v676_v56  ;;  %v682_v18 = vrot.slane %v681_v8, 4  ;;  %v704_v22 = vrot.slane %v702_v10, 4  ;;  %v2382_v60 = vld [vmem:[%s2501_s5 + $0x3c] sm:$0xff]   ;;  %v2160_v7 = vld [vmem:[%s2501_s5 + $0x24] sm:$0xf] }
  0x33   : > { %v695_v21 = vor.u32 %v694_v13, %v691_v12  ;;  %v710_v23 = vrot.slane %v708_v14, 5  ;;  %v713_v25 = vshrl.u32 %v538_v0, 16  ;;  %v716_v27 = vshll.u32 %v538_v0, 16  ;;  %v2161_v12 = vld [vmem:[%s2501_s5 + $0x28] sm:$0xf] }
  0x34   : > { %2280 = vmatprep.mubr.msk.bf16.mxu1 %vm286_vm0, %v2088_v16  ;;  %v687_v26 = vsel %vm2519_vm3, %v682_v18, %v686_v3  ;;  %v722_v28 = vshll.u32 %v539_v6, 16  ;;  %v726_v29 = vshrl.u32 %v539_v6, 16  ;;  %v705_v34 = vor.u32 %v704_v22, %v700_v19  ;;  %v2163_v18 = vld [vmem:[%s2501_s5 + $0x30] sm:$0xf] }
  0x35   : > { %v2089_v31 = vcombine.low %v677_v17, %v687_v26  ;;  %v696_v32 = vrot.slane %v695_v21, 4  ;;  %v715_v35 = vrot.slane %v713_v25, 4  ;;  %v718_v37 = vrot.slane %v716_v27, 5  ;;  %v2162_v17 = vld [vmem:[%s2501_s5 + $0x2c] sm:$0x1] }
  0x36   : > { %v724_v38 = vrot.slane %v722_v28, 5  ;;  %v728_v39 = vrot.slane %v726_v29, 4  ;;  %v732_v2 = vshll.u32 %v540_v24, 16  ;;  %v706_v43 = vrot.slane %v705_v34, 4  ;;  %v2383_v29 = vld [vmem:[%s2501_s5 + $0x48] sm:$0xff]  }
  0x37   : > { %2291 = vmatmul.mubr.msk.bf16.vlgmr.msra.gmra.mrb[16].mxu0 %vm286_vm0, %v2379_v15  ;;  %v701_v42 = vsel %vm2519_vm3, %v696_v32, %v700_v19  ;;  %v1387_v44 = vshrl.u32 %v2154_v30, 16  ;;  %v1390_v45 = vshll.u32 %v2154_v30, 16  ;;  %v719_v47 = vor.u32 %v718_v37, %v715_v35  ;;  %v2164_v37 = vld [vmem:[%s2501_s5 + $0x34] sm:$0xf] }
  0x38   : > { %2294 = vmatprep.mubr.msk.bf16.mxu0 %vm286_vm0, %v2380_v20  ;;  %2281 = vmatmul.mubr.msk.bf16.gmra.mrb[8].mxu1 %vm286_vm0, %v2089_v31  ;;  %v729_v48 = vor.u32 %v728_v39, %v724_v38  ;;  %v734_v49 = vrot.slane %v732_v2, 5  ;;  %v1396_v50 = vshll.u32 %v2155_v36, 16  ;;  %v711_v51 = vsel %vm2519_vm3, %v706_v43, %v710_v23 }
  0x39   : > { %v1389_v53 = vrot.slane %v1387_v44, 4  ;;  %v1392_v54 = vrot.slane %v1390_v45, 5  ;;  %v1400_v55 = vshrl.u32 %v2155_v36, 16  ;;  %v2090_v56 = vcombine.low %v701_v42, %v711_v51  ;;  %v2165_v45 = vld [vmem:[%s2501_s5 + $0x38] sm:$0x1] }
  0x3a   : > { %v720_v57 = vrot.slane %v719_v47, 4  ;;  %v730_v58 = vrot.slane %v729_v48, 4  ;;  %v1398_v59 = vrot.slane %v1396_v50, 5  ;;  %v1406_v63 = vshll.u32 %v2156_v40, 16  ;;  %v2166_v51 = vld [vmem:[%s2501_s5 + $0x3c] sm:$0xf] }
  0x3b   : > { %v1393_v61 = vor.u32 %v1392_v54, %v1389_v53  ;;  %v1402_v62 = vrot.slane %v1400_v55, 4  ;;  %v1411_v0 = vshrl.u32 %v2157_v41, 16  ;;  %2284 = vmatprep.mubr.msk.bf16.mxu1 %vm286_vm0, %v2090_v56  ;;  %v1414_v5 = vshll.u32 %v2157_v41, 16  ;;  %v2167_v56 = vld [vmem:[%s2501_s5 + $0x40] sm:$0xf] }
  0x3c   : > { %v725_v1 = vsel %vm2519_vm3, %v720_v57, %v724_v38  ;;  %v735_v3 = vsel %vm2519_vm3, %v730_v58, %v734_v49  ;;  %v1420_v6 = vshll.u32 %v2158_v46, 16  ;;  %v1408_v11 = vrot.slane %v1406_v63, 5  ;;  %v2384_v38 = vld [vmem:[%s2501_s5 + $0x54] sm:$0xff]  }
  0x3d   : > { %v2091_v8 = vcombine.low %v725_v1, %v735_v3  ;;  %v1394_v9 = vrot.slane %v1393_v61, 4  ;;  %v1403_v10 = vor.u32 %v1402_v62, %v1398_v59  ;;  %v1413_v13 = vrot.slane %v1411_v0, 4  ;;  %v2168_v0 = vld [vmem:[%s2501_s5 + $0x44] sm:$0x1] }
  0x3e   : > { %v1416_v14 = vrot.slane %v1414_v5, 5  ;;  %v1422_v15 = vrot.slane %v1420_v6, 5  ;;  %v1424_v16 = vshrl.u32 %v2158_v46, 16  ;;  %v1430_v21 = vshll.u32 %v2159_v4, 16  ;;  %v2385_v5 = vld [vmem:[%s2501_s5 + $0x60] sm:$0xff]  }
  0x3f   : > { %2295 = vmatmul.mubr.msk.bf16.gmra.mrb[20].mxu0 %vm286_vm0, %v2381_v52  ;;  %v1399_v19 = vsel %vm2519_vm3, %v1394_v9, %v1398_v59  ;;  %v1404_v20 = vrot.slane %v1403_v10, 4  ;;  %v1435_v22 = vshrl.u32 %v2160_v7, 16  ;;  %v1438_v25 = vshll.u32 %v2160_v7, 16 }
  0x40   : > { %2298 = vmatprep.mubr.msk.bf16.mxu0 %vm286_vm0, %v2382_v60  ;;  %2285 = vmatmul.mubr.msk.bf16.gmra.mrb[12].mxu1 %vm286_vm0, %v2091_v8  ;;  %v1417_v23 = vor.u32 %v1416_v14, %v1413_v13  ;;  %v1426_v24 = vrot.slane %v1424_v16, 4  ;;  %v1444_v26 = vshll.u32 %v2161_v12, 16  ;;  %v1432_v28 = vrot.slane %v1430_v21, 5  ;;  %v2169_v8 = vld [vmem:[%s2501_s5 + $0x48] sm:$0xf] }
  0x41   : > { %v1409_v27 = vsel %vm2519_vm3, %v1404_v20, %v1408_v11  ;;  %v1437_v30 = vrot.slane %v1435_v22, 4  ;;  %v1448_v31 = vshrl.u32 %v2161_v12, 16  ;;  %v1440_v36 = vrot.slane %v1438_v25, 5  ;;  %v2170_v13 = vld [vmem:[%s2501_s5 + $0x4c] sm:$0xf] }
  0x42   : > { %v2180_v32 = vcombine.low %v1399_v19, %v1409_v27  ;;  %v1418_v34 = vrot.slane %v1417_v23, 4  ;;  %v1427_v35 = vor.u32 %v1426_v24, %v1422_v15  ;;  %v1446_v39 = vrot.slane %v1444_v26, 5  ;;  %v2171_v20 = vld [vmem:[%s2501_s5 + $0x50] sm:$0x1]  ;;  %v2172_v27 = vld [vmem:[%s2501_s5 + $0x54] sm:$0xf] }
  0x43   : > { %v1450_v2 = vrot.slane %v1448_v31, 4  ;;  %v1454_v40 = vshll.u32 %v2162_v17, 16  ;;  %v1459_v41 = vshrl.u32 %v2163_v18, 16  ;;  %v1441_v44 = vor.u32 %v1440_v36, %v1437_v30 }
  0x44   : > { %2308 = vmatprep.mubr.msk.bf16.mxu1 %vm286_vm0, %v2180_v32  ;;  %v1423_v42 = vsel %vm2519_vm3, %v1418_v34, %v1422_v15  ;;  %v1428_v43 = vrot.slane %v1427_v35, 4  ;;  %v1462_v46 = vshll.u32 %v2163_v18, 16  ;;  %v1468_v50 = vshll.u32 %v2164_v37, 16  ;;  %v2173_v32 = vld [vmem:[%s2501_s5 + $0x58] sm:$0xf] }
  0x45   : > { %v1451_v47 = vor.u32 %v1450_v2, %v1446_v39  ;;  %v1456_v48 = vrot.slane %v1454_v40, 5  ;;  %v1461_v49 = vrot.slane %v1459_v41, 4  ;;  %v1442_v53 = vrot.slane %v1441_v44, 4 }
  0x46   : > { %v1433_v52 = vsel %vm2519_vm3, %v1428_v43, %v1432_v28  ;;  %v1464_v54 = vrot.slane %v1462_v46, 5  ;;  %v1472_v55 = vshrl.u32 %v2164_v37, 16  ;;  %v1470_v59 = vrot.slane %v1468_v50, 5  ;;  %v2174_v43 = vld [vmem:[%s2501_s5 + $0x5c] sm:$0x1] }
  0x47   : > { %2299 = vmatmul.mubr.msk.bf16.gmra.mrb[24].mxu0 %vm286_vm0, %v2383_v29  ;;  %v2181_v57 = vcombine.low %v1423_v42, %v1433_v52  ;;  %v1452_v58 = vrot.slane %v1451_v47, 4  ;;  %v1478_v60 = vshll.u32 %v2165_v45, 16  ;;  %v1447_v61 = vsel %vm2519_vm3, %v1442_v53, %v1446_v39  ;;  %v2175_v50 = vld [vmem:[%s2501_s5 + $0x60] sm:$0xf] }
  0x48   : > { %2302 = vmatprep.mubr.msk.bf16.mxu0 %vm286_vm0, %v2384_v38  ;;  %v1465_v62 = vor.u32 %v1464_v54, %v1461_v49  ;;  %v1474_v63 = vrot.slane %v1472_v55, 4  ;;  %v1483_v1 = vshrl.u32 %v2166_v51, 16  ;;  %v1486_v6 = vshll.u32 %v2166_v51, 16  ;;  %v2176_v55 = vld [vmem:[%s2501_s5 + $0x64] sm:$0xf] }
  0x49   : > { %2309 = vmatmul.mubr.msk.bf16.vlgmr.msra.gmra.mrb[16].mxu1 %vm286_vm0, %v2181_v57  ;;  %v1457_v3 = vsel %vm2519_vm3, %v1452_v58, %v1456_v48  ;;  %v1480_v4 = vrot.slane %v1478_v60, 5  ;;  %v1492_v7 = vshll.u32 %v2167_v56, 16  ;;  %v1496_v16 = vshrl.u32 %v2167_v56, 16 }
  0x4a   : > { %v2182_v9 = vcombine.low %v1447_v61, %v1457_v3  ;;  %v1466_v10 = vrot.slane %v1465_v62, 4  ;;  %v1475_v11 = vor.u32 %v1474_v63, %v1470_v59  ;;  %v1485_v12 = vrot.slane %v1483_v1, 4  ;;  %v2177_v62 = vld [vmem:[%s2501_s5 + $0x68] sm:$0x1] }
  0x4b   : > { %v1488_v14 = vrot.slane %v1486_v6, 5  ;;  %v1494_v15 = vrot.slane %v1492_v7, 5  ;;  %v1502_v17 = vshll.u32 %v2168_v0, 16  ;;  %v1507_v21 = vshrl.u32 %v2169_v8, 16 }
  0x4c   : > { %2312 = vmatprep.mubr.msk.bf16.mxu1 %vm286_vm0, %v2182_v9  ;;  %v1471_v18 = vsel %vm2519_vm3, %v1466_v10, %v1470_v59  ;;  %v1476_v19 = vrot.slane %v1475_v11, 4  ;;  %v1510_v22 = vshll.u32 %v2169_v8, 16  ;;  %v1498_v24 = vrot.slane %v1496_v16, 4 }
  0x4d   : > { %v1489_v23 = vor.u32 %v1488_v14, %v1485_v12  ;;  %v1504_v25 = vrot.slane %v1502_v17, 5  ;;  %v1516_v26 = vshll.u32 %v2170_v13, 16  ;;  %v1509_v29 = vrot.slane %v1507_v21, 4 }
  0x4e   : > { %v1481_v28 = vsel %vm2519_vm3, %v1476_v19, %v1480_v4  ;;  %v1512_v30 = vrot.slane %v1510_v22, 5  ;;  %v1520_v31 = vshrl.u32 %v2170_v13, 16  ;;  %v1499_v36 = vor.u32 %v1498_v24, %v1494_v15 }
  0x4f   : > { %2303 = vmatmul.mubr.msk.bf16.gmra.mrb[28].mxu0 %vm286_vm0, %v2385_v5  ;;  %v2183_v34 = vcombine.low %v1471_v18, %v1481_v28  ;;  %v1490_v35 = vrot.slane %v1489_v23, 4  ;;  %v1518_v37 = vrot.slane %v1516_v26, 5  ;;  %v1526_v2 = vshll.u32 %v2171_v20, 16 }
  0x50   : > { %v1513_v38 = vor.u32 %v1512_v30, %v1509_v29  ;;  %v1522_v39 = vrot.slane %v1520_v31, 4  ;;  %v1531_v40 = vshrl.u32 %v2172_v27, 16  ;;  %v1500_v42 = vrot.slane %v1499_v36, 4 }
  0x51   : > { %2313 = vmatmul.mubr.msk.bf16.gmra.mrb[20].mxu1 %vm286_vm0, %v2183_v34  ;;  %v1495_v41 = vsel %vm2519_vm3, %v1490_v35, %v1494_v15  ;;  %v1534_v44 = vshll.u32 %v2172_v27, 16  ;;  %v1540_v45 = vshll.u32 %v2173_v32, 16  ;;  %v1528_v48 = vrot.slane %v1526_v2, 5 }
  0x52   : > { %v1514_v46 = vrot.slane %v1513_v38, 4  ;;  %v1523_v47 = vor.u32 %v1522_v39, %v1518_v37  ;;  %v1533_v49 = vrot.slane %v1531_v40, 4  ;;  %v1505_v51 = vsel %vm2519_vm3, %v1500_v42, %v1504_v25 }
  0x53   : > { %v1536_v52 = vrot.slane %v1534_v44, 5  ;;  %v1542_v53 = vrot.slane %v1540_v45, 5  ;;  %v1544_v54 = vshrl.u32 %v2173_v32, 16  ;;  %v2184_v56 = vcombine.low %v1495_v41, %v1505_v51 }
  0x54   : > { %v1519_v57 = vsel %vm2519_vm3, %v1514_v46, %v1518_v37  ;;  %v1524_v58 = vrot.slane %v1523_v47, 4  ;;  %v1550_v59 = vshll.u32 %v2174_v43, 16  ;;  %v1555_v63 = vshrl.u32 %v2175_v50, 16 }
  0x55   : > { %v1537_v60 = vor.u32 %v1536_v52, %v1533_v49  ;;  %v1546_v61 = vrot.slane %v1544_v54, 4  ;;  %v1558_v0 = vshll.u32 %v2175_v50, 16  ;;  %2316 = vmatprep.mubr.msk.bf16.mxu1 %vm286_vm0, %v2184_v56  ;;  %v1564_v4 = vshll.u32 %v2176_v55, 16 }
  0x56   : > { %v1529_v1 = vsel %vm2519_vm3, %v1524_v58, %v1528_v48  ;;  %v1552_v3 = vrot.slane %v1550_v59, 5  ;;  %v1568_v5 = vshrl.u32 %v2176_v55, 16  ;;  %v1557_v9 = vrot.slane %v1555_v63, 4 }
  0x57   : > { %v2185_v6 = vcombine.low %v1519_v57, %v1529_v1  ;;  %v1538_v7 = vrot.slane %v1537_v60, 4  ;;  %v1547_v8 = vor.u32 %v1546_v61, %v1542_v53  ;;  %v1560_v10 = vrot.slane %v1558_v0, 5 }
  0x58   : > { %v1566_v11 = vrot.slane %v1564_v4, 5  ;;  %v1570_v12 = vrot.slane %v1568_v5, 4  ;;  %v1574_v13 = vshll.u32 %v2177_v62, 16 }
  0x59   : > { %2317 = vmatmul.mubr.msk.bf16.gmra.mrb[24].mxu1 %vm286_vm0, %v2185_v6  ;;  %v1543_v14 = vsel %vm2519_vm3, %v1538_v7, %v1542_v53  ;;  %v1548_v15 = vrot.slane %v1547_v8, 4  ;;  %v1561_v16 = vor.u32 %v1560_v10, %v1557_v9 }
  0x5a   : > { %v1571_v17 = vor.u32 %v1570_v12, %v1566_v11  ;;  %v1576_v18 = vrot.slane %v1574_v13, 5 }
  0x5b   : > { %v1553_v19 = vsel %vm2519_vm3, %v1548_v15, %v1552_v3  ;;  %v1562_v21 = vrot.slane %v1561_v16, 4 }
  0x5c   : > { %v2186_v20 = vcombine.low %v1543_v14, %v1553_v19  ;;  %v1572_v22 = vrot.slane %v1571_v17, 4 }
  0x5d   : > { %v1567_v23 = vsel %vm2519_vm3, %v1562_v21, %v1566_v11 }
  0x5e   : > { %2320 = vmatprep.mubr.msk.bf16.mxu1 %vm286_vm0, %v2186_v20  ;;  %v1577_v24 = vsel %vm2519_vm3, %v1572_v22, %v1576_v18 }
  0x5f   : > { %v2187_v25 = vcombine.low %v1567_v23, %v1577_v24 }
  0x61   : > { %2321 = vmatmul.mubr.msk.bf16.gmra.mrb[28].mxu1 %vm286_vm0, %v2187_v25 }
  0xea   : > { %v2256_v33 = vpop.f32.mrb[0].mxu0 }
  0xeb   : > { %503 = vst.msk [vmem:[%s2675_s20 + $0x20] sm:$0xff] %vm408_vm4, %v2256_v33  ;;  %v345_v26 = vpop.f32.mrb[1].mxu0  ;;  %v449_v27 = vmul.f32 %v2256_v33, %v2256_v33  ;;  %v412_v31 = vsel %vm408_vm4, %v2256_v33, 0.0 }
  0xec   : > { %v409_v28 = vsel %vm408_vm4, %v345_v26, 0.0  ;;  %v447_v29 = vmul.f32 %v345_v26, %v345_v26  ;;  %501 = vst.msk [vmem:[%s2675_s20] sm:$0xff] %vm408_vm4, %v345_v26  ;;  %v2257_v30 = vpop.f32.mrb[2].mxu0 }
  0xed   : > { %504 = vst.msk [vmem:[%s2675_s20 + $0x28] sm:$0xff] %vm408_vm4, %v2257_v30  ;;  %v348_v32 = vpop.f32.mrb[3].mxu0  ;;  %v450_v35 = vmul.f32 %v2257_v30, %v2257_v30  ;;  %v466_v39 = vsel %vm408_vm4, %v449_v27, 0.0  ;;  %v414_v2 = vsel %vm408_vm4, %v2257_v30, 0.0 }
  0xee   : > { %v463_v34 = vsel %vm408_vm4, %v447_v29, 0.0  ;;  %v410_v36 = vsel %vm408_vm4, %v348_v32, 0.0  ;;  %v448_v37 = vmul.f32 %v348_v32, %v348_v32  ;;  %502 = vst.msk [vmem:[%s2675_s20 + $0x8] sm:$0xff] %vm408_vm4, %v348_v32 }
  0xef   : > { %v411_v38 = vadd.f32 %v410_v36, %v409_v28  ;;  %v468_v43 = vsel %vm408_vm4, %v450_v35, 0.0 }
  0xf0   : > { %v464_v40 = vsel %vm408_vm4, %v448_v37, 0.0 }
  0xf1   : > { %v413_v41 = vadd.f32 %v412_v31, %v411_v38  ;;  %v465_v42 = vadd.f32 %v464_v40, %v463_v34 }
  0xf2   : > { %v2260_v44 = vpop.f32.mrb[4].mxu0 }
  0xf3   : > { %v467_v45 = vadd.f32 %v466_v39, %v465_v42  ;;  %507 = vst.msk [vmem:[%s2675_s20 + $0x60] sm:$0xff] %vm408_vm4, %v2260_v44  ;;  %v361_v46 = vpop.f32.mrb[5].mxu0  ;;  %v415_v47 = vadd.f32 %v414_v2, %v413_v41  ;;  %v453_v48 = vmul.f32 %v2260_v44, %v2260_v44  ;;  %v420_v55 = vsel %vm408_vm4, %v2260_v44, 0.0 }
  0xf4   : > { %v416_v49 = vsel %vm408_vm4, %v361_v46, 0.0  ;;  %v451_v50 = vmul.f32 %v361_v46, %v361_v46  ;;  %505 = vst.msk [vmem:[%s2675_s20 + $0x40] sm:$0xff] %vm408_vm4, %v361_v46  ;;  %v2261_v51 = vpop.f32.mrb[6].mxu0 }
  0xf5   : > { %v417_v52 = vadd.f32 %v416_v49, %v415_v47  ;;  %v469_v53 = vadd.f32 %v468_v43, %v467_v45  ;;  %508 = vst.msk [vmem:[%s2675_s20 + $0x68] sm:$0xff] %vm408_vm4, %v2261_v51  ;;  %v364_v54 = vpop.f32.mrb[7].mxu0  ;;  %v454_v60 = vmul.f32 %v2261_v51, %v2261_v51  ;;  %v474_v62 = vsel %vm408_vm4, %v453_v48, 0.0 }
  0xf6   : > { %v470_v56 = vsel %vm408_vm4, %v451_v50, 0.0  ;;  %v418_v57 = vsel %vm408_vm4, %v364_v54, 0.0  ;;  %v452_v58 = vmul.f32 %v364_v54, %v364_v54  ;;  %506 = vst.msk [vmem:[%s2675_s20 + $0x48] sm:$0xff] %vm408_vm4, %v364_v54  ;;  %v422_v63 = vsel %vm408_vm4, %v2261_v51, 0.0 }
  0xf7   : > { %v471_v59 = vadd.f32 %v470_v56, %v469_v53  ;;  %v419_v61 = vadd.f32 %v418_v57, %v417_v52  ;;  %v476_v6 = vsel %vm408_vm4, %v454_v60, 0.0 }
  0xf8   : > { %v472_v0 = vsel %vm408_vm4, %v452_v58, 0.0 }
  0xf9   : > { %v421_v1 = vadd.f32 %v420_v55, %v419_v61  ;;  %v473_v3 = vadd.f32 %v472_v0, %v471_v59  ;;  %v2274_v5 = vpop.f32.mrb[0].mxu1 }
  0xfa   : > { %v2264_v4 = vpop.f32.mrb[8].mxu0  ;;  %1002 = vrot.lane.b32.xlu1 %v2274_v5, %s2426_s21  ;;  %v827_v11 = vpop.f32.mrb[1].mxu1  ;;  %v893_v20 = vsel %vm408_vm4, %v2274_v5, 0.0  ;;  %v930_v21 = vmul.f32 %v2274_v5, %v2274_v5 }
  0xfb   : > { %v475_v7 = vadd.f32 %v474_v62, %v473_v3  ;;  %v457_v8 = vmul.f32 %v2264_v4, %v2264_v4  ;;  %511 = vst.msk [vmem:[%s2675_s20 + $0xa0] sm:$0xff] %vm408_vm4, %v2264_v4  ;;  %v377_v9 = vpop.f32.mrb[9].mxu0  ;;  %v423_v10 = vadd.f32 %v422_v63, %v421_v1  ;;  %v928_v15 = vmul.f32 %v827_v11, %v827_v11  ;;  %v2275_v16 = vpop.f32.mrb[2].mxu1 }
  0xfc   : > { %v424_v12 = vsel %vm408_vm4, %v377_v9, 0.0  ;;  %v455_v13 = vmul.f32 %v377_v9, %v377_v9  ;;  %509 = vst.msk [vmem:[%s2675_s20 + $0x80] sm:$0xff] %vm408_vm4, %v377_v9  ;;  %v2265_v14 = vpop.f32.mrb[10].mxu0  ;;  %998 = vrot.lane.b32.xlu0 %v827_v11, %s2426_s21  ;;  %v428_v17 = vsel %vm408_vm4, %v2264_v4, 0.0  ;;  %v890_v22 = vsel %vm408_vm4, %v827_v11, 0.0  ;;  %v830_v23 = vpop.f32.mrb[3].mxu1 }
  0xfd   : > { %v425_v18 = vadd.f32 %v424_v12, %v423_v10  ;;  %512 = vst.msk [vmem:[%s2675_s20 + $0xa8] sm:$0xff] %vm408_vm4, %v2265_v14  ;;  %v380_v19 = vpop.f32.mrb[11].mxu0  ;;  %v477_v24 = vadd.f32 %v476_v6, %v475_v7  ;;  %v891_v25 = vsel %vm408_vm4, %v830_v23, 0.0  ;;  %v929_v33 = vmul.f32 %v830_v23, %v830_v23 }
  0xfe   : > { %510 = vst.msk [vmem:[%s2675_s20 + $0x88] sm:$0xff] %vm408_vm4, %v380_v19  ;;  %v482_v26 = vsel %vm408_vm4, %v457_v8, 0.0  ;;  %v478_v27 = vsel %vm408_vm4, %v455_v13, 0.0  ;;  %v944_v28 = vsel %vm408_vm4, %v928_v15, 0.0  ;;  %v931_v29 = vmul.f32 %v2275_v16, %v2275_v16  ;;  %1004 = vrot.lane.b32.xlu1 %v2275_v16, %s2426_s21 }
  0xff   : > { %v892_v30 = vadd.f32 %v891_v25, %v890_v22  ;;  %v479_v31 = vadd.f32 %v478_v27, %v477_v24  ;;  %v945_v32 = vsel %vm408_vm4, %v929_v33, 0.0  ;;  %v458_v34 = vmul.f32 %v2265_v14, %v2265_v14 }
 0x100   : > { %1000 = vrot.lane.b32.xlu0 %v830_v23, %s2426_s21  ;;  %v426_v35 = vsel %vm408_vm4, %v380_v19, 0.0  ;;  %v456_v36 = vmul.f32 %v380_v19, %v380_v19  ;;  %v947_v37 = vsel %vm408_vm4, %v930_v21, 0.0  ;;  %v946_v39 = vadd.f32 %v945_v32, %v944_v28 }
 0x101   : > { %v894_v38 = vadd.f32 %v893_v20, %v892_v30  ;;  %v427_v2 = vadd.f32 %v426_v35, %v425_v18  ;;  %v895_v41 = vsel %vm408_vm4, %v2275_v16, 0.0  ;;  %v430_v42 = vsel %vm408_vm4, %v2265_v14, 0.0 }
 0x102   : > { %v2268_v40 = vpop.f32.mrb[12].mxu0  ;;  %v480_v43 = vsel %vm408_vm4, %v456_v36, 0.0  ;;  %v948_v46 = vadd.f32 %v947_v37, %v946_v39  ;;  %v949_v51 = vsel %vm408_vm4, %v931_v29, 0.0  ;;  %v484_v53 = vsel %vm408_vm4, %v458_v34, 0.0 }
 0x103   : > { %v461_v44 = vmul.f32 %v2268_v40, %v2268_v40  ;;  %515 = vst.msk [vmem:[%s2675_s20 + $0xe0] sm:$0xff] %vm408_vm4, %v2268_v40  ;;  %v393_v45 = vpop.f32.mrb[13].mxu0  ;;  %v896_v47 = vadd.f32 %v895_v41, %v894_v38  ;;  %v429_v48 = vadd.f32 %v428_v17, %v427_v2  ;;  %v481_v49 = vadd.f32 %v480_v43, %v479_v31  ;;  %v2278_v52 = vpop.f32.mrb[4].mxu1 }
 0x104   : > { %513 = vst.msk [vmem:[%s2675_s20 + $0xc0] sm:$0xff] %vm408_vm4, %v393_v45  ;;  %v2269_v50 = vpop.f32.mrb[14].mxu0  ;;  %v459_v54 = vmul.f32 %v393_v45, %v393_v45  ;;  %v843_v56 = vpop.f32.mrb[5].mxu1  ;;  %v950_v57 = vadd.f32 %v949_v51, %v948_v46  ;;  %1010 = vrot.lane.b32.xlu0 %v2278_v52, %s2426_s21  ;;  %v436_v59 = vsel %vm408_vm4, %v2268_v40, 0.0  ;;  %v432_v60 = vsel %vm408_vm4, %v393_v45, 0.0 }
 0x105   : > { %516 = vst.msk [vmem:[%s2675_s20 + $0xe8] sm:$0xff] %vm408_vm4, %v2269_v50  ;;  %v396_v55 = vpop.f32.mrb[15].mxu0  ;;  %v483_v58 = vadd.f32 %v482_v26, %v481_v49  ;;  %v897_v61 = vsel %vm408_vm4, %v843_v56, 0.0  ;;  %v932_v62 = vmul.f32 %v843_v56, %v843_v56  ;;  %v2279_v63 = vpop.f32.mrb[6].mxu1  ;;  %v2750_v0 = vsel %vm408_vm4, %v461_v44, 0.0 }
 0x106   : > { %514 = vst.msk [vmem:[%s2675_s20 + $0xc8] sm:$0xff] %vm408_vm4, %v396_v55  ;;  %v431_v1 = vadd.f32 %v430_v42, %v429_v48  ;;  %v901_v3 = vsel %vm408_vm4, %v2278_v52, 0.0  ;;  %v934_v4 = vmul.f32 %v2278_v52, %v2278_v52  ;;  %v898_v5 = vadd.f32 %v897_v61, %v896_v47  ;;  %1012 = vrot.lane.b32.xlu1 %v2279_v63, %s2426_s21  ;;  %v846_v6 = vpop.f32.mrb[7].mxu1 }
 0x107   : > { %v486_v7 = vsel %vm408_vm4, %v459_v54, 0.0  ;;  %v951_v8 = vsel %vm408_vm4, %v932_v62, 0.0  ;;  %v899_v9 = vsel %vm408_vm4, %v846_v6, 0.0  ;;  %v933_v10 = vmul.f32 %v846_v6, %v846_v6 }
 0x108   : > { %v433_v11 = vadd.f32 %v432_v60, %v431_v1  ;;  %v952_v12 = vadd.f32 %v951_v8, %v950_v57  ;;  %v935_v13 = vmul.f32 %v2279_v63, %v2279_v63  ;;  %v900_v14 = vadd.f32 %v899_v9, %v898_v5  ;;  %1006 = vrot.lane.b32.xlu0 %v843_v56, %s2426_s21 }
 0x109   : > { %v485_v15 = vadd.f32 %v484_v53, %v483_v58  ;;  %v953_v17 = vsel %vm408_vm4, %v933_v10, 0.0  ;;  %v462_v18 = vmul.f32 %v2269_v50, %v2269_v50  ;;  %v434_v19 = vsel %vm408_vm4, %v396_v55, 0.0 }
 0x10a   : > { %v2292_v16 = vpop.f32.mrb[16].mxu0  ;;  %v460_v20 = vmul.f32 %v396_v55, %v396_v55  ;;  %v902_v22 = vadd.f32 %v901_v3, %v900_v14  ;;  %v954_v23 = vadd.f32 %v953_v17, %v952_v12  ;;  %1008 = vrot.lane.b32.xlu1 %v846_v6, %s2426_s21  ;;  %v435_v25 = vadd.f32 %v434_v19, %v433_v11 }
 0x10b   : > { %2140 = vst.msk [vmem:[%s2675_s20 + $0x30] sm:$0xff] %vm408_vm4, %v2292_v16  ;;  %v2762_v21 = vpop.f32.mrb[17].mxu0  ;;  %v487_v24 = vadd.f32 %v486_v7, %v485_v15  ;;  %v955_v26 = vsel %vm408_vm4, %v934_v4, 0.0  ;;  %v903_v27 = vsel %vm408_vm4, %v2279_v63, 0.0  ;;  %v2282_v28 = vpop.f32.mrb[8].mxu1  ;;  %v438_v29 = vsel %vm408_vm4, %v2269_v50, 0.0 }
 0x10c   : > { %2138 = vst.msk [vmem:[%s2675_s20 + $0x10] sm:$0xff] %vm408_vm4, %v2762_v21  ;;  %v2768_v33 = vpop.f32.mrb[18].mxu0  ;;  %v488_v30 = vsel %vm408_vm4, %v460_v20, 0.0  ;;  %v957_v32 = vsel %vm408_vm4, %v935_v13, 0.0  ;;  %v956_v34 = vadd.f32 %v955_v26, %v954_v23  ;;  %v938_v35 = vmul.f32 %v2282_v28, %v2282_v28  ;;  %v859_v36 = vpop.f32.mrb[9].mxu1  ;;  %1018 = vrot.lane.b32.xlu0 %v2282_v28, %s2426_s21 }
 0x10d   : > { %2141 = vst.msk [vmem:[%s2675_s20 + $0x38] sm:$0xff] %vm408_vm4, %v2768_v33  ;;  %v2777_v31 = vpop.f32.mrb[19].mxu0  ;;  %v904_v37 = vadd.f32 %v903_v27, %v902_v22  ;;  %v905_v38 = vsel %vm408_vm4, %v859_v36, 0.0  ;;  %v936_v39 = vmul.f32 %v859_v36, %v859_v36  ;;  %v2283_v2 = vpop.f32.mrb[10].mxu1  ;;  %v437_v40 = vadd.f32 %v436_v59, %v435_v25 }
 0x10e   : > { %2139 = vst.msk [vmem:[%s2675_s20 + $0x18] sm:$0xff] %vm408_vm4, %v2777_v31  ;;  %v489_v41 = vadd.f32 %v488_v30, %v487_v24  ;;  %v958_v43 = vadd.f32 %v957_v32, %v956_v34  ;;  %1020 = vrot.lane.b32.xlu1 %v2283_v2, %s2426_s21  ;;  %v862_v44 = vpop.f32.mrb[11].mxu1  ;;  %v492_v45 = vsel %vm408_vm4, %v462_v18, 0.0  ;;  %v1293_v46 = vmul.f32 %v2292_v16, %v2292_v16 }
 0x10f   : > { %v906_v42 = vadd.f32 %v905_v38, %v904_v37  ;;  %v959_v47 = vsel %vm408_vm4, %v936_v39, 0.0  ;;  %v939_v48 = vmul.f32 %v2283_v2, %v2283_v2  ;;  %v907_v49 = vsel %vm408_vm4, %v862_v44, 0.0 }
 0x110   : > { %v937_v50 = vmul.f32 %v862_v44, %v862_v44  ;;  %v960_v51 = vadd.f32 %v959_v47, %v958_v43  ;;  %1014 = vrot.lane.b32.xlu0 %v859_v36, %s2426_s21  ;;  %v439_v53 = vadd.f32 %v438_v29, %v437_v40  ;;  %v491_v54 = vadd.f32 %v2750_v0, %v489_v41 }
 0x111   : > { %v908_v52 = vadd.f32 %v907_v49, %v906_v42  ;;  %v909_v56 = vsel %vm408_vm4, %v2282_v28, 0.0  ;;  %v963_v57 = vsel %vm408_vm4, %v938_v35, 0.0  ;;  %v1256_v59 = vsel %vm408_vm4, %v2292_v16, 0.0 }
 0x112   : > { %v2791_v55 = vpop.f32.mrb[20].mxu0  ;;  %v961_v58 = vsel %vm408_vm4, %v937_v50, 0.0  ;;  %v440_v63 = vrot.slane %v439_v53, 4  ;;  %v493_v0 = vadd.f32 %v492_v45, %v491_v54  ;;  %1016 = vrot.lane.b32.xlu1 %v862_v44, %s2426_s21  ;;  %v911_v3 = vsel %vm408_vm4, %v2283_v2, 0.0 }
 0x113   : > { %2144 = vst.msk [vmem:[%s2675_s20 + $0x70] sm:$0xff] %vm408_vm4, %v2791_v55  ;;  %v2800_v60 = vpop.f32.mrb[21].mxu0  ;;  %v910_v61 = vadd.f32 %v909_v56, %v908_v52  ;;  %v962_v62 = vadd.f32 %v961_v58, %v960_v51  ;;  %v965_v4 = vsel %vm408_vm4, %v939_v48, 0.0  ;;  %v2811_v5 = vsel %vm408_vm4, %v1293_v46, 0.0  ;;  %v2286_v6 = vpop.f32.mrb[12].mxu1 }
 0x114   : > { %2142 = vst.msk [vmem:[%s2675_s20 + $0x50] sm:$0xff] %vm408_vm4, %v2800_v60  ;;  %v2806_v1 = vpop.f32.mrb[22].mxu0  ;;  %v1253_v7 = vsel %vm408_vm4, %v2762_v21, 0.0  ;;  %v441_v10 = vadd.f32 %v440_v63, %v439_v53  ;;  %v494_v11 = vrot.slane %v493_v0, 4  ;;  %v1291_v12 = vmul.f32 %v2762_v21, %v2762_v21  ;;  %v875_v13 = vpop.f32.mrb[13].mxu1  ;;  %1026 = vrot.lane.b32.xlu0 %v2286_v6, %s2426_s21 }
 0x115   : > { %2145 = vst.msk [vmem:[%s2675_s20 + $0x78] sm:$0xff] %vm408_vm4, %v2806_v1  ;;  %v2818_v8 = vpop.f32.mrb[23].mxu0  ;;  %v964_v9 = vadd.f32 %v963_v57, %v962_v62  ;;  %v912_v14 = vadd.f32 %v911_v3, %v910_v61  ;;  %v913_v15 = vsel %vm408_vm4, %v875_v13, 0.0  ;;  %v1294_v16 = vmul.f32 %v2768_v33, %v2768_v33  ;;  %v2287_v17 = vpop.f32.mrb[14].mxu1 }
 0x116   : > { %2143 = vst.msk [vmem:[%s2675_s20 + $0x58] sm:$0xff] %vm408_vm4, %v2818_v8  ;;  %v1254_v18 = vsel %vm408_vm4, %v2777_v31, 0.0  ;;  %v442_v19 = vrot.slane %v441_v10, 2  ;;  %v495_v20 = vadd.f32 %v494_v11, %v493_v0  ;;  %v940_v22 = vmul.f32 %v875_v13, %v875_v13  ;;  %1028 = vrot.lane.b32.xlu1 %v2287_v17, %s2426_s21  ;;  %v878_v23 = vpop.f32.mrb[15].mxu1 }
 0x117   : > { %v966_v21 = vadd.f32 %v965_v4, %v964_v9  ;;  %v917_v24 = vsel %vm408_vm4, %v2286_v6, 0.0  ;;  %v942_v25 = vmul.f32 %v2286_v6, %v2286_v6  ;;  %v914_v26 = vadd.f32 %v913_v15, %v912_v14 }
 0x118   : > { %v1258_v27 = vsel %vm408_vm4, %v2768_v33, 0.0  ;;  %v443_v28 = vadd.f32 %v442_v19, %v441_v10  ;;  %v496_v29 = vrot.slane %v495_v20, 2  ;;  %v1307_v30 = vsel %vm408_vm4, %v1291_v12, 0.0  ;;  %1022 = vrot.lane.b32.xlu0 %v875_v13, %s2426_s21 }
 0x119   : > { %v967_v32 = vsel %vm408_vm4, %v940_v22, 0.0  ;;  %v1255_v36 = vadd.f32 %v1254_v18, %v1253_v7  ;;  %v1292_v37 = vmul.f32 %v2777_v31, %v2777_v31  ;;  %v915_v38 = vsel %vm408_vm4, %v878_v23, 0.0 }
 0x11a   : > { %v2838_v34 = vpop.f32.mrb[24].mxu0  ;;  %v968_v35 = vadd.f32 %v967_v32, %v966_v21  ;;  %v497_v39 = vadd.f32 %v496_v29, %v495_v20  ;;  %v1312_v2 = vsel %vm408_vm4, %v1294_v16, 0.0  ;;  %v919_v40 = vsel %vm408_vm4, %v2287_v17, 0.0  ;;  %1024 = vrot.lane.b32.xlu1 %v878_v23, %s2426_s21 }
 0x11b   : > { %2148 = vst.msk [vmem:[%s2675_s20 + $0xb0] sm:$0xff] %vm408_vm4, %v2838_v34  ;;  %v2846_v33 = vpop.f32.mrb[25].mxu0  ;;  %v916_v41 = vadd.f32 %v915_v38, %v914_v26  ;;  %v943_v42 = vmul.f32 %v2287_v17, %v2287_v17  ;;  %v1257_v43 = vadd.f32 %v1256_v59, %v1255_v36  ;;  %v1308_v44 = vsel %vm408_vm4, %v1292_v37, 0.0 }
 0x11c   : > { %2146 = vst.msk [vmem:[%s2675_s20 + $0x90] sm:$0xff] %vm408_vm4, %v2846_v33  ;;  %v2854_v31 = vpop.f32.mrb[26].mxu0  ;;  %v941_v45 = vmul.f32 %v878_v23, %v878_v23  ;;  %v444_v47 = vrot.slane %v443_v28, 1  ;;  %v498_v48 = vrot.slane %v497_v39, 1  ;;  %v1309_v49 = vadd.f32 %v1308_v44, %v1307_v30  ;;  %v2310_v51 = vpop.f32.mrb[16].mxu1 }
 0x11d   : > { %2149 = vst.msk [vmem:[%s2675_s20 + $0xb8] sm:$0xff] %vm408_vm4, %v2854_v31  ;;  %v2860_v46 = vpop.f32.mrb[27].mxu0  ;;  %v918_v50 = vadd.f32 %v917_v24, %v916_v41  ;;  %v1297_v53 = vmul.f32 %v2791_v55, %v2791_v55  ;;  %v1259_v54 = vadd.f32 %v1258_v27, %v1257_v43  ;;  %v1260_v56 = vsel %vm408_vm4, %v2800_v60, 0.0  ;;  %v1669_v57 = vpop.f32.mrb[17].mxu1  ;;  %1844 = vrot.lane.b32.xlu0 %v2310_v51, %s2426_s21 }
 0x11e   : > { %2147 = vst.msk [vmem:[%s2675_s20 + $0x98] sm:$0xff] %vm408_vm4, %v2860_v46  ;;  %v969_v52 = vsel %vm408_vm4, %v941_v45, 0.0  ;;  %v971_v58 = vsel %vm408_vm4, %v942_v25, 0.0  ;;  %v1311_v59 = vadd.f32 %v2811_v5, %v1309_v49  ;;  %v2873_v63 = vpop.f32.mrb[18].mxu1  ;;  %v973_v0 = vsel %vm408_vm4, %v943_v42, 0.0 }
 0x11f   : > { %v920_v61 = vadd.f32 %v919_v40, %v918_v50  ;;  %v970_v62 = vadd.f32 %v969_v52, %v968_v35  ;;  %v1264_v3 = vsel %vm408_vm4, %v2791_v55, 0.0  ;;  %v1261_v4 = vadd.f32 %v1260_v56, %v1259_v54  ;;  %1846 = vrot.lane.b32.xlu1 %v2873_v63, %s2426_s21  ;;  %v1672_v7 = vpop.f32.mrb[19].mxu1 }
 0x120   : > { %v1295_v6 = vmul.f32 %v2800_v60, %v2800_v60  ;;  %v2882_v9 = vadd.f32 %v444_v47, %v443_v28  ;;  %v1313_v11 = vadd.f32 %v1312_v2, %v1311_v59  ;;  %v2886_v13 = vadd.f32 %v498_v48, %v497_v39 }
 0x121   : > { %v921_v5 = vrot.slane %v920_v61, 4  ;;  %v972_v10 = vadd.f32 %v971_v58, %v970_v62  ;;  %v1318_v55 = vsel %vm408_vm4, %v1297_v53, 0.0  ;;  %v1298_v60 = vmul.f32 %v2806_v1, %v2806_v1  ;;  %1840 = vrot.lane.b32.xlu0 %v1669_v57, %s2426_s21 }
 0x122   : > { %v2884_v12 = vpop.f32.mrb[28].mxu0  ;;  %v1314_v14 = vsel %vm408_vm4, %v1295_v6, 0.0  ;;  %v1735_v19 = vsel %vm408_vm4, %v2310_v51, 0.0  ;;  %v1772_v22 = vmul.f32 %v2310_v51, %v2310_v51  ;;  %v1770_v21 = vmul.f32 %v1669_v57, %v1669_v57 }
 0x123   : > { %2152 = vst.msk [vmem:[%s2675_s20 + $0xf0] sm:$0xff] %vm408_vm4, %v2884_v12  ;;  %v2896_v15 = vpop.f32.mrb[29].mxu0  ;;  %v922_v16 = vadd.f32 %v921_v5, %v920_v61  ;;  %v974_v17 = vadd.f32 %v973_v0, %v972_v10  ;;  %v1315_v18 = vadd.f32 %v1314_v14, %v1313_v11  ;;  %v1262_v23 = vsel %vm408_vm4, %v2818_v8, 0.0  ;;  %1842 = vrot.lane.b32.xlu1 %v1672_v7, %s2426_s21 }
 0x124   : > { %2150 = vst.msk [vmem:[%s2675_s20 + $0xd0] sm:$0xff] %vm408_vm4, %v2896_v15  ;;  %v2902_v20 = vpop.f32.mrb[30].mxu0  ;;  %v1296_v24 = vmul.f32 %v2818_v8, %v2818_v8  ;;  %v1266_v28 = vsel %vm408_vm4, %v2806_v1, 0.0  ;;  %v1263_v29 = vadd.f32 %v1262_v23, %v1261_v4  ;;  %v2916_v30 = vpop.f32.mrb[20].mxu1  ;;  %v1320_v8 = vsel %vm408_vm4, %v1298_v60, 0.0 }
 0x125   : > { %2153 = vst.msk [vmem:[%s2675_s20 + $0xf8] sm:$0xff] %vm408_vm4, %v2902_v20  ;;  %v2912_v25 = vpop.f32.mrb[31].mxu0  ;;  %v923_v26 = vrot.slane %v922_v16, 2  ;;  %v975_v27 = vrot.slane %v974_v17, 4  ;;  %v1732_v32 = vsel %vm408_vm4, %v1669_v57, 0.0  ;;  %v1733_v36 = vsel %vm408_vm4, %v1672_v7, 0.0  ;;  %1852 = vrot.lane.b32.xlu0 %v2916_v30, %s2426_s21 }
 0x126   : > { %2151 = vst.msk [vmem:[%s2675_s20 + $0xd8] sm:$0xff] %vm408_vm4, %v2912_v25  ;;  %v1316_v35 = vsel %vm408_vm4, %v1296_v24, 0.0  ;;  %v1685_v37 = vpop.f32.mrb[21].mxu1  ;;  %v1265_v39 = vadd.f32 %v1264_v3, %v1263_v29  ;;  %v1786_v41 = vsel %vm408_vm4, %v1770_v21, 0.0  ;;  %v1773_v42 = vmul.f32 %v2873_v63, %v2873_v63 }
 0x127   : > { %v924_v38 = vadd.f32 %v923_v26, %v922_v16  ;;  %v976_v1 = vadd.f32 %v975_v27, %v974_v17  ;;  %v1317_v2 = vadd.f32 %v1316_v35, %v1315_v18  ;;  %v2927_v40 = vpop.f32.mrb[22].mxu1  ;;  %v1734_v43 = vadd.f32 %v1733_v36, %v1732_v32 }
 0x128   : > { %v1771_v44 = vmul.f32 %v1672_v7, %v1672_v7  ;;  %1854 = vrot.lane.b32.xlu1 %v2927_v40, %s2426_s21  ;;  %v1688_v45 = vpop.f32.mrb[23].mxu1  ;;  %v1301_v50 = vmul.f32 %v2838_v34, %v2838_v34  ;;  %v1267_v53 = vadd.f32 %v1266_v28, %v1265_v39  ;;  %v1268_v54 = vsel %vm408_vm4, %v2846_v33, 0.0 }
 0x129   : > { %v925_v47 = vrot.slane %v924_v38, 1  ;;  %v977_v48 = vrot.slane %v976_v1, 2  ;;  %v1319_v49 = vadd.f32 %v1318_v55, %v1317_v2  ;;  %v1736_v51 = vadd.f32 %v1735_v19, %v1734_v43  ;;  %1848 = vrot.lane.b32.xlu0 %v1685_v37, %s2426_s21 }
 0x12a   : > { %v1787_v52 = vsel %vm408_vm4, %v1771_v44, 0.0  ;;  %v1789_v58 = vsel %vm408_vm4, %v1772_v22, 0.0  ;;  %v1737_v61 = vsel %vm408_vm4, %v2873_v63, 0.0  ;;  %v1269_v62 = vadd.f32 %v1268_v54, %v1267_v53 }
 0x12b   : > { %v926_v56 = vadd.f32 %v925_v47, %v924_v38  ;;  %v978_v57 = vadd.f32 %v977_v48, %v976_v1  ;;  %v1788_v59 = vadd.f32 %v1787_v52, %v1786_v41  ;;  %v1299_v0 = vmul.f32 %v2846_v33, %v2846_v33 }
 0x12c   : > { %v1321_v3 = vadd.f32 %v1320_v8, %v1319_v49  ;;  %1850 = vrot.lane.b32.xlu1 %v1688_v45, %s2426_s21  ;;  %v1791_v7 = vsel %vm408_vm4, %v1773_v42, 0.0  ;;  %v2950_v10 = vpop.f32.mrb[24].mxu1  ;;  %v1272_v11 = vsel %vm408_vm4, %v2838_v34, 0.0  ;;  %v1326_v63 = vsel %vm408_vm4, %v1301_v50, 0.0 }
 0x12d   : > { %v2947_v4 = vadd.f32 %v926_v56, %v2882_v9  ;;  %v979_v6 = vrot.slane %v978_v57, 1  ;;  %v1790_v5 = vadd.f32 %v1789_v58, %v1788_v59  ;;  %v1322_v55 = vsel %vm408_vm4, %v1299_v0, 0.0  ;;  %v1701_v14 = vpop.f32.mrb[25].mxu1  ;;  %1860 = vrot.lane.b32.xlu0 %v2950_v10, %s2426_s21 }
 0x12e   : > { %v1738_v33 = vadd.f32 %v1737_v61, %v1736_v51  ;;  %v1323_v60 = vadd.f32 %v1322_v55, %v1321_v3  ;;  %v1776_v16 = vmul.f32 %v2916_v30, %v2916_v30  ;;  %v1739_v17 = vsel %vm408_vm4, %v1685_v37, 0.0  ;;  %v2961_v18 = vpop.f32.mrb[26].mxu1 }
 0x12f   : > { %v980_v9 = vadd.f32 %v979_v6, %v978_v57  ;;  %v1274_v34 = vsel %vm408_vm4, %v2854_v31, 0.0  ;;  %v1774_v22 = vmul.f32 %v1685_v37, %v1685_v37  ;;  %v1792_v21 = vadd.f32 %v1791_v7, %v1790_v5  ;;  %v2967_v23 = vpop.f32.mrb[27].mxu1 }
 0x130   : > { %v1740_v19 = vadd.f32 %v1739_v17, %v1738_v33  ;;  %1862 = vrot.lane.b32.xlu1 %v2961_v18, %s2426_s21  ;;  %v1302_v26 = vmul.f32 %v2854_v31, %v2854_v31  ;;  %v1270_v27 = vsel %vm408_vm4, %v2860_v46, 0.0  ;;  %v1300_v28 = vmul.f32 %v2860_v46, %v2860_v46 }
 0x131   : > { %v2970_v24 = vadd.f32 %v980_v9, %v2886_v13  ;;  %v1793_v29 = vsel %vm408_vm4, %v1774_v22, 0.0  ;;  %v1271_v8 = vadd.f32 %v1270_v27, %v1269_v62  ;;  %v1777_v32 = vmul.f32 %v2927_v40, %v2927_v40  ;;  %1856 = vrot.lane.b32.xlu0 %v1701_v14, %s2426_s21 }
 0x132   : > { %v1741_v35 = vsel %vm408_vm4, %v1688_v45, 0.0  ;;  %v1794_v13 = vadd.f32 %v1793_v29, %v1792_v21  ;;  %v1324_v36 = vsel %vm408_vm4, %v1300_v28, 0.0  ;;  %v1775_v37 = vmul.f32 %v1688_v45, %v1688_v45 }
 0x133   : > { %v1742_v31 = vadd.f32 %v1741_v35, %v1740_v19  ;;  %v1743_v38 = vsel %vm408_vm4, %v2916_v30, 0.0  ;;  %v1273_v1 = vadd.f32 %v1272_v11, %v1271_v8  ;;  %v1325_v46 = vadd.f32 %v1324_v36, %v1323_v60 }
 0x134   : > { %1858 = vrot.lane.b32.xlu1 %v2967_v23, %s2426_s21  ;;  %v1328_v39 = vsel %vm408_vm4, %v1302_v26, 0.0  ;;  %v1795_v41 = vsel %vm408_vm4, %v1775_v37, 0.0  ;;  %v1276_v42 = vsel %vm408_vm4, %v2896_v15, 0.0  ;;  %v2992_v43 = vpop.f32.mrb[28].mxu1  ;;  %v1303_v30 = vmul.f32 %v2896_v15, %v2896_v15 }
 0x135   : > { %v1744_v2 = vadd.f32 %v1743_v38, %v1742_v31  ;;  %v1327_v44 = vadd.f32 %v1326_v63, %v1325_v46  ;;  %v1796_v45 = vadd.f32 %v1795_v41, %v1794_v13  ;;  %v1275_v47 = vadd.f32 %v1274_v34, %v1273_v1  ;;  %v1717_v48 = vpop.f32.mrb[29].mxu1 }
 0x136   : > { %v1797_v49 = vsel %vm408_vm4, %v1776_v16, 0.0  ;;  %v1745_v50 = vsel %vm408_vm4, %v2927_v40, 0.0  ;;  %v1799_v51 = vsel %vm408_vm4, %v1777_v32, 0.0  ;;  %v1305_v52 = vmul.f32 %v2884_v12, %v2884_v12  ;;  %1864 = vrot.lane.b32.xlu0 %v1717_v48, %s2426_s21  ;;  %v3003_v53 = vpop.f32.mrb[30].mxu1 }
 0x137   : > { %v1798_v54 = vadd.f32 %v1797_v49, %v1796_v45  ;;  %v1277_v56 = vadd.f32 %v1276_v42, %v1275_v47  ;;  %v1329_v57 = vadd.f32 %v1328_v39, %v1327_v44  ;;  %v1330_v15 = vsel %vm408_vm4, %v1303_v30, 0.0  ;;  %v1720_v58 = vpop.f32.mrb[31].mxu1 }
 0x138   : > { %v1280_v59 = vsel %vm408_vm4, %v2884_v12, 0.0  ;;  %v1306_v40 = vmul.f32 %v2902_v20, %v2902_v20  ;;  %v1746_v61 = vadd.f32 %v1745_v50, %v1744_v2  ;;  %v1747_v62 = vsel %vm408_vm4, %v1701_v14, 0.0  ;;  %1866 = vrot.lane.b32.xlu1 %v1720_v58, %s2426_s21 }
 0x139   : > { %v1331_v0 = vadd.f32 %v1330_v15, %v1329_v57  ;;  %v1778_v3 = vmul.f32 %v1701_v14, %v1701_v14  ;;  %v1800_v6 = vadd.f32 %v1799_v51, %v1798_v54  ;;  %v1278_v7 = vsel %vm408_vm4, %v2912_v25, 0.0 }
 0x13a   : > { %v1334_v5 = vsel %vm408_vm4, %v1305_v52, 0.0  ;;  %v1748_v11 = vadd.f32 %v1747_v62, %v1746_v61  ;;  %v1279_v63 = vadd.f32 %v1278_v7, %v1277_v56  ;;  %v1304_v12 = vmul.f32 %v2912_v25, %v2912_v25  ;;  %1868 = vrot.lane.b32.xlu0 %v2992_v43, %s2426_s21 }
 0x13b   : > { %v1751_v55 = vsel %vm408_vm4, %v2950_v10, 0.0  ;;  %v1282_v33 = vsel %vm408_vm4, %v2902_v20, 0.0  ;;  %v1801_v14 = vsel %vm408_vm4, %v1778_v3, 0.0  ;;  %v1749_v9 = vsel %vm408_vm4, %v2967_v23, 0.0 }
 0x13c   : > { %v1802_v60 = vadd.f32 %v1801_v14, %v1800_v6  ;;  %v1281_v16 = vadd.f32 %v1280_v59, %v1279_v63  ;;  %v1332_v17 = vsel %vm408_vm4, %v1304_v12, 0.0  ;;  %v1750_v34 = vadd.f32 %v1749_v9, %v1748_v11  ;;  %1870 = vrot.lane.b32.xlu1 %v3003_v53, %s2426_s21 }
 0x13d   : > { %v1780_v25 = vmul.f32 %v2950_v10, %v2950_v10  ;;  %v1336_v19 = vsel %vm408_vm4, %v1306_v40, 0.0  ;;  %v1333_v22 = vadd.f32 %v1332_v17, %v1331_v0  ;;  %v1779_v20 = vmul.f32 %v2967_v23, %v2967_v23 }
 0x13e   : > { %v1283_v21 = vadd.f32 %v1282_v33, %v1281_v16  ;;  %v1753_v26 = vsel %vm408_vm4, %v2961_v18, 0.0  ;;  %v1781_v27 = vmul.f32 %v2961_v18, %v2961_v18  ;;  %v1752_v28 = vadd.f32 %v1751_v55, %v1750_v34 }
 0x13f   : > { %v1335_v29 = vadd.f32 %v1334_v5, %v1333_v22  ;;  %v1803_v8 = vsel %vm408_vm4, %v1779_v20, 0.0  ;;  %v1755_v32 = vsel %vm408_vm4, %v1717_v48, 0.0  ;;  %v1782_v10 = vmul.f32 %v1717_v48, %v1717_v48 }
 0x140   : > { %v1284_v35 = vrot.slane %v1283_v21, 4  ;;  %v1804_v13 = vadd.f32 %v1803_v8, %v1802_v60  ;;  %v1754_v36 = vadd.f32 %v1753_v26, %v1752_v28  ;;  %v1805_v31 = vsel %vm408_vm4, %v1780_v25, 0.0 }
 0x141   : > { %v1337_v23 = vadd.f32 %v1336_v19, %v1335_v29  ;;  %v1757_v37 = vsel %vm408_vm4, %v1720_v58, 0.0  ;;  %v1783_v39 = vmul.f32 %v1720_v58, %v1720_v58  ;;  %v1807_v2 = vsel %vm408_vm4, %v1781_v27, 0.0 }
 0x142   : > { %v1285_v38 = vadd.f32 %v1284_v35, %v1283_v21  ;;  %v1806_v1 = vadd.f32 %v1805_v31, %v1804_v13  ;;  %v1756_v46 = vadd.f32 %v1755_v32, %v1754_v36  ;;  %v1809_v41 = vsel %vm408_vm4, %v1782_v10, 0.0 }
 0x143   : > { %v1338_v18 = vrot.slane %v1337_v23, 4  ;;  %v1759_v30 = vsel %vm408_vm4, %v2992_v43, 0.0  ;;  %v1784_v48 = vmul.f32 %v2992_v43, %v2992_v43  ;;  %v1811_v49 = vsel %vm408_vm4, %v1783_v39, 0.0 }
 0x144   : > { %v1286_v42 = vrot.slane %v1285_v38, 2  ;;  %v1808_v44 = vadd.f32 %v1807_v2, %v1806_v1  ;;  %v1758_v45 = vadd.f32 %v1757_v37, %v1756_v46  ;;  %v1761_v56 = vsel %vm408_vm4, %v3003_v53, 0.0 }
 0x145   : > { %v1339_v47 = vadd.f32 %v1338_v18, %v1337_v23  ;;  %v1785_v57 = vmul.f32 %v3003_v53, %v3003_v53  ;;  %v1813_v43 = vsel %vm408_vm4, %v1784_v48, 0.0 }
 0x146   : > { %v1287_v50 = vadd.f32 %v1286_v42, %v1285_v38  ;;  %v1810_v51 = vadd.f32 %v1809_v41, %v1808_v44  ;;  %v1760_v52 = vadd.f32 %v1759_v30, %v1758_v45 }
 0x147   : > { %v1340_v54 = vrot.slane %v1339_v47, 2  ;;  %v1815_v6 = vsel %vm408_vm4, %v1785_v57, 0.0 }
 0x148   : > { %v1288_v15 = vrot.slane %v1287_v50, 1  ;;  %v1762_v58 = vadd.f32 %v1761_v56, %v1760_v52  ;;  %v1812_v59 = vadd.f32 %v1811_v49, %v1810_v51 }
 0x149   : > { %v1341_v40 = vadd.f32 %v1340_v54, %v1339_v47 }
 0x14a   : > { %v1289_v61 = vadd.f32 %v1288_v15, %v1287_v50  ;;  %v1763_v62 = vrot.slane %v1762_v58, 4  ;;  %v1814_v0 = vadd.f32 %v1813_v43, %v1812_v59 }
 0x14b   : > { %v1342_v3 = vrot.slane %v1341_v40, 1 }
 0x14c   : > { %v1290_v7 = vadd.f32 %v1289_v61, %v2947_v4  ;;  %v1764_v5 = vadd.f32 %v1763_v62, %v1762_v58  ;;  %v1816_v11 = vadd.f32 %v1815_v6, %v1814_v0 }
 0x14d   : > { %v1343_v53 = vadd.f32 %v1342_v3, %v1341_v40 }
 0x14e   : > { %v1765_v63 = vrot.slane %v1764_v5, 2  ;;  %v1817_v12 = vrot.slane %v1816_v11, 4 }
 0x14f   : > { %v1344_v55 = vadd.f32 %v1343_v53, %v2970_v24 }
 0x150   : > { %v1766_v33 = vadd.f32 %v1765_v63, %v1764_v5  ;;  %v1818_v14 = vadd.f32 %v1817_v12, %v1816_v11 }
 0x152   : > { %v1767_v9 = vrot.slane %v1766_v33, 1  ;;  %v1819_v60 = vrot.slane %v1818_v14, 2 }
 0x154   : > { %v1768_v16 = vadd.f32 %v1767_v9, %v1766_v33  ;;  %v1820_v17 = vadd.f32 %v1819_v60, %v1818_v14 }
 0x156   : > { %v1769_v4 = vadd.f32 %v1768_v16, %v1290_v7  ;;  %v1821_v24 = vrot.slane %v1820_v17, 1 }
 0x158   : > { %v1822_v34 = vadd.f32 %v1821_v24, %v1820_v17  ;;  %1905 = vst.msk [vmem:[%s216_s26] sm:$0x1] %vm1904_vm5, %v1769_v4 }
 0x15a   : > { %v1823_v25 = vadd.f32 %v1822_v34, %v1344_v55 }
 0x15c   : > { %1906 = vst.msk [vmem:[%s216_s26 + $0x1] sm:$0x1] %vm1904_vm5, %v1823_v25 }
 0x16c   : > { %v1003_v19 = vpop.permute.xlu1 %1002 }
 0x16d   : > { %1049 = vst.msk [vmem:[%s2675_s20 + $0x20] sm:$0xff] %vm1046_vm6, %v1003_v19 }
 0x16e   : > { %v999_v22 = vpop.permute.xlu0 %998 }
 0x16f   : > { %1047 = vst.msk [vmem:[%s2675_s20] sm:$0xff] %vm1046_vm6, %v999_v22 }
 0x170   : > { %v1005_v20 = vpop.permute.xlu1 %1004 }
 0x171   : > { %1050 = vst.msk [vmem:[%s2675_s20 + $0x28] sm:$0xff] %vm1046_vm6, %v1005_v20 }
 0x172   : > { %v1001_v21 = vpop.permute.xlu0 %1000 }
 0x173   : > { %1048 = vst.msk [vmem:[%s2675_s20 + $0x8] sm:$0xff] %vm1046_vm6, %v1001_v21 }
 0x176   : > { %v1011_v26 = vpop.permute.xlu0 %1010 }
 0x177   : > { %1053 = vst.msk [vmem:[%s2675_s20 + $0x60] sm:$0xff] %vm1046_vm6, %v1011_v26 }
 0x178   : > { %v1013_v27 = vpop.permute.xlu1 %1012 }
 0x179   : > { %1054 = vst.msk [vmem:[%s2675_s20 + $0x68] sm:$0xff] %vm1046_vm6, %v1013_v27 }
 0x17a   : > { %v1007_v28 = vpop.permute.xlu0 %1006 }
 0x17b   : > { %1051 = vst.msk [vmem:[%s2675_s20 + $0x40] sm:$0xff] %vm1046_vm6, %v1007_v28 }
 0x17c   : > { %v1009_v29 = vpop.permute.xlu1 %1008 }
 0x17d   : > { %1052 = vst.msk [vmem:[%s2675_s20 + $0x48] sm:$0xff] %vm1046_vm6, %v1009_v29 }
 0x17e   : > { %v1019_v8 = vpop.permute.xlu0 %1018 }
 0x17f   : > { %1057 = vst.msk [vmem:[%s2675_s20 + $0xa0] sm:$0xff] %vm1046_vm6, %v1019_v8 }
 0x180   : > { %v1021_v32 = vpop.permute.xlu1 %1020 }
 0x181   : > { %1058 = vst.msk [vmem:[%s2675_s20 + $0xa8] sm:$0xff] %vm1046_vm6, %v1021_v32 }
 0x182   : > { %v1015_v10 = vpop.permute.xlu0 %1014 }
 0x183   : > { %1055 = vst.msk [vmem:[%s2675_s20 + $0x80] sm:$0xff] %vm1046_vm6, %v1015_v10 }
 0x184   : > { %v1017_v35 = vpop.permute.xlu1 %1016 }
 0x185   : > { %1056 = vst.msk [vmem:[%s2675_s20 + $0x88] sm:$0xff] %vm1046_vm6, %v1017_v35 }
 0x186   : > { %v1027_v13 = vpop.permute.xlu0 %1026 }
 0x187   : > { %1061 = vst.msk [vmem:[%s2675_s20 + $0xe0] sm:$0xff] %vm1046_vm6, %v1027_v13 }
 0x188   : > { %v1029_v36 = vpop.permute.xlu1 %1028 }
 0x189   : > { %1062 = vst.msk [vmem:[%s2675_s20 + $0xe8] sm:$0xff] %vm1046_vm6, %v1029_v36 }
 0x18a   : > { %v1023_v31 = vpop.permute.xlu0 %1022 }
 0x18b   : > { %1059 = vst.msk [vmem:[%s2675_s20 + $0xc0] sm:$0xff] %vm1046_vm6, %v1023_v31 }
 0x18c   : > { %v1025_v23 = vpop.permute.xlu1 %1024 }
 0x18d   : > { %1060 = vst.msk [vmem:[%s2675_s20 + $0xc8] sm:$0xff] %vm1046_vm6, %v1025_v23 }
 0x18f   : > { %v1845_v37 = vpop.permute.xlu0 %1844 }
 0x190   : > { %2199 = vst.msk [vmem:[%s2675_s20 + $0x30] sm:$0xff] %vm1046_vm6, %v1845_v37 }
 0x191   : > { %v1847_v38 = vpop.permute.xlu1 %1846 }
 0x192   : > { %2200 = vst.msk [vmem:[%s2675_s20 + $0x38] sm:$0xff] %vm1046_vm6, %v1847_v38 }
 0x193   : > { %v1841_v1 = vpop.permute.xlu0 %1840 }
 0x194   : > { %2197 = vst.msk [vmem:[%s2675_s20 + $0x10] sm:$0xff] %vm1046_vm6, %v1841_v1 }
 0x195   : > { %v1843_v46 = vpop.permute.xlu1 %1842 }
 0x196   : > { %2198 = vst.msk [vmem:[%s2675_s20 + $0x18] sm:$0xff] %vm1046_vm6, %v1843_v46 }
 0x197   : > { %v1853_v39 = vpop.permute.xlu0 %1852 }
 0x198   : > { %2203 = vst.msk [vmem:[%s2675_s20 + $0x70] sm:$0xff] %vm1046_vm6, %v1853_v39 }
 0x19a   : > { %v1855_v18 = vpop.permute.xlu1 %1854 }
 0x19b   : > { %2204 = vst.msk [vmem:[%s2675_s20 + $0x78] sm:$0xff] %vm1046_vm6, %v1855_v18  ;;  %v1849_v2 = vpop.permute.xlu0 %1848 }
 0x19c   : > { %2201 = vst.msk [vmem:[%s2675_s20 + $0x50] sm:$0xff] %vm1046_vm6, %v1849_v2 }
 0x19e   : > { %v1851_v41 = vpop.permute.xlu1 %1850 }
 0x19f   : > { %2202 = vst.msk [vmem:[%s2675_s20 + $0x58] sm:$0xff] %vm1046_vm6, %v1851_v41  ;;  %v1861_v42 = vpop.permute.xlu0 %1860 }
 0x1a0   : > { %2207 = vst.msk [vmem:[%s2675_s20 + $0xb0] sm:$0xff] %vm1046_vm6, %v1861_v42 }
 0x1a2   : > { %v1863_v44 = vpop.permute.xlu1 %1862 }
 0x1a3   : > { %2208 = vst.msk [vmem:[%s2675_s20 + $0xb8] sm:$0xff] %vm1046_vm6, %v1863_v44  ;;  %v1857_v45 = vpop.permute.xlu0 %1856 }
 0x1a4   : > { %2205 = vst.msk [vmem:[%s2675_s20 + $0x90] sm:$0xff] %vm1046_vm6, %v1857_v45 }
 0x1a6   : > { %v1859_v47 = vpop.permute.xlu1 %1858 }
 0x1a7   : > { %2206 = vst.msk [vmem:[%s2675_s20 + $0x98] sm:$0xff] %vm1046_vm6, %v1859_v47 }
 0x1a8   : > { %v1865_v30 = vpop.permute.xlu0 %1864 }
 0x1a9   : > { %2209 = vst.msk [vmem:[%s2675_s20 + $0xd0] sm:$0xff] %vm1046_vm6, %v1865_v30 }
 0x1aa   : > { %v1867_v48 = vpop.permute.xlu1 %1866 }
 0x1ab   : > { %2210 = vst.msk [vmem:[%s2675_s20 + $0xd8] sm:$0xff] %vm1046_vm6, %v1867_v48 }
 0x1ac   : > { %v1869_v49 = vpop.permute.xlu0 %1868 }
 0x1ad   : > { %2211 = vst.msk [vmem:[%s2675_s20 + $0xf0] sm:$0xff] %vm1046_vm6, %v1869_v49 }
 0x1ae   : > { %v1871_v50 = vpop.permute.xlu1 %1870 }
 0x1af   : > { %2212 = vst.msk [vmem:[%s2675_s20 + $0xf8] sm:$0xff] %vm1046_vm6, %v1871_v50 }
 0x1b0 PF: > { %s14_s16 = sadd.s32 1, %s2424_s16   ;;  %s3148_s12 = smov %s2416_s14 }
 0x1b1   : > { %p11_p8 = scmp.ge.s32.totalorder %s14_s16, 6   ;;  %s3149_s13 = smov %s2420_s15 }
 0x1b2   : > { %s3150_s14 = smov %s3153_s17  ;;  %s3151_s15 = smov %s3157_s18 }
 0x1b3   :  { %13 = sbr.rel (!%p11_p8) target bundleno = 3 (0x3), region = 76 }

</bundles_post_ra>
